<compile_context>
chip_gen: v7x
topology: tpu7x:2x2x1
jax: 0.10.0
libtpu: 0.0.40
codegen_flags: <defaults>
</compile_context>

<pallas_src>
import math

import jax
import jax.numpy as jnp
from jax.experimental import pallas as pl
from jax.experimental.pallas import tpu as pltpu

# ---- model hyper-parameters (small, consistent with the module __init__) ----
VOCAB = 32
EMBED = 32          # embedding_dim (d_model)
HIDDEN = 64         # dim_feedforward
NUM_CLASSES = 8
NUM_HEADS = 4
NUM_LAYERS = 2
HEAD_DIM = EMBED // NUM_HEADS
LN_EPS = 1e-5

BATCH = 2
SEQ = 8
ROWS = BATCH * SEQ          # 16 activation rows, ordered b*SEQ + s

# rows of the packed per-layer vector slab (L, 8, 3*EMBED)
R_BQKV, R_BO, R_LN1G, R_LN1B, R_B1, R_B2, R_LN2G, R_LN2B = range(8)


def _layernorm(x, gamma, beta):
    mu = jnp.mean(x, axis=-1, keepdims=True)
    var = jnp.mean(jnp.square(x - mu), axis=-1, keepdims=True)
    return (x - mu) * jax.lax.rsqrt(var + LN_EPS) * gamma + beta


# --------------------------- fused forward kernel ----------------------------
def fused_forward_kernel(x_ref, wqkv_ref, wo_ref, w1_ref, w2_ref, vec_ref,
                         wfc_ref, bfc_ref, out_ref):
    x = x_ref[...]                                    # (ROWS, E)

    for l in range(NUM_LAYERS):                       # static, fully unrolled
        wqkv = wqkv_ref[l]                            # (E, 3E)
        wo = wo_ref[l]                                # (E, E)
        w1 = w1_ref[l]                                # (E, HIDDEN)
        w2 = w2_ref[l]                                # (HIDDEN, E)
        vec = vec_ref[l]                              # (8, 3E) packed vectors

        # ----- multi-head self-attention (scale pre-folded into Wq) -----
        qkv = jnp.dot(x, wqkv, preferred_element_type=jnp.float32)
        qkv = qkv + vec[R_BQKV:R_BQKV + 1, :]         # (ROWS, 3E)

        attn = jnp.zeros((ROWS, EMBED), jnp.float32)
        for h in range(NUM_HEADS):                    # static, 4 iterations
            q0 = h * HEAD_DIM
            k0 = EMBED + h * HEAD_DIM
            v0 = 2 * EMBED + h * HEAD_DIM
            qh = qkv[:, q0:q0 + HEAD_DIM].reshape(BATCH, SEQ, HEAD_DIM)
            kh = qkv[:, k0:k0 + HEAD_DIM].reshape(BATCH, SEQ, HEAD_DIM)
            vh = qkv[:, v0:v0 + HEAD_DIM].reshape(BATCH, SEQ, HEAD_DIM)

            sc = jnp.einsum('bqd,bkd->bqk', qh, kh,
                            preferred_element_type=jnp.float32)   # (B,S,S)
            sc = sc - jnp.max(sc, axis=-1, keepdims=True)
            p = jnp.exp(sc)
            p = p * pl.reciprocal(jnp.sum(p, axis=-1, keepdims=True),
                                  approx=True)
            oh = jnp.einsum('bqk,bkd->bqd', p, vh,
                            preferred_element_type=jnp.float32)   # (B,S,Dh)
            # fold the output projection per head -> no lane concat needed
            attn = attn + jnp.dot(oh.reshape(ROWS, HEAD_DIM),
                                  wo[q0:q0 + HEAD_DIM, :],
                                  preferred_element_type=jnp.float32)
        attn = attn + vec[R_BO:R_BO + 1, :EMBED]

        # residual + LayerNorm1 (post-norm, PyTorch default norm_first=False)
        y = _layernorm(x + attn,
                       vec[R_LN1G:R_LN1G + 1, :EMBED],
                       vec[R_LN1B:R_LN1B + 1, :EMBED])

        # ----- feed-forward (ReLU activation, PyTorch default) -----
        h1 = jnp.dot(y, w1, preferred_element_type=jnp.float32)
        h1 = jnp.maximum(h1 + vec[R_B1:R_B1 + 1, :HIDDEN], 0.0)
        h2 = jnp.dot(h1, w2, preferred_element_type=jnp.float32)
        h2 = h2 + vec[R_B2:R_B2 + 1, :EMBED]

        x = _layernorm(y + h2,
                       vec[R_LN2G:R_LN2G + 1, :EMBED],
                       vec[R_LN2B:R_LN2B + 1, :EMBED])

    # ----- classifier head: mean over seq + linear + softmax(dim=1) -----
    pooled = jnp.sum(x.reshape(BATCH, SEQ, EMBED), axis=1) * (1.0 / SEQ)
    logits = jnp.dot(pooled, wfc_ref[...],
                     preferred_element_type=jnp.float32) + bfc_ref[...]
    logits = logits - jnp.max(logits, axis=-1, keepdims=True)
    e = jnp.exp(logits)
    out_ref[...] = e / jnp.sum(e, axis=-1, keepdims=True)   # exact normalize


# ------------------------------- wrapper -------------------------------------
def forward(ids, params):
    # embedding gather (glue, plain JAX) -> (B, S, E); flatten batch-major.
    # Row ordering differs from PyTorch's seq-first permute but is equivalent:
    # all ops are per-row except attention / pooling, which group by batch.
    emb = params["embedding"][ids]
    x2d = emb.reshape(ROWS, EMBED).astype(jnp.float32)

    vmem = pl.BlockSpec(memory_space=pltpu.MemorySpace.VMEM)
    args = (x2d, params["wqkv"], params["wo"], params["w1"], params["w2"],
            params["vecs"], params["wfc"], params["bfc"])
    return pl.pallas_call(
        fused_forward_kernel,
        out_shape=jax.ShapeDtypeStruct((BATCH, NUM_CLASSES), jnp.float32),
        in_specs=[vmem] * len(args),
        out_specs=vmem,
    )(*args)


# ------------------------- deterministic init --------------------------------
def init_params(key):
    def nrm(k, shape, scale=0.02):
        return (scale * jax.random.normal(k, shape)).astype(jnp.float32)

    def padded_row(v):
        return jnp.zeros((3 * EMBED,), jnp.float32).at[:v.shape[0]].set(v)

    attn_scale = 1.0 / math.sqrt(HEAD_DIM)
    keys = iter(jax.random.split(key, 2 + NUM_LAYERS * 4))

    embedding = nrm(next(keys), (VOCAB, EMBED), 1.0)
    wfc = nrm(next(keys), (EMBED, NUM_CLASSES))
    bfc = jnp.zeros((1, NUM_CLASSES), jnp.float32)

    wqkv_l, wo_l, w1_l, w2_l, vec_l = [], [], [], [], []
    for _ in range(NUM_LAYERS):
        wqkv = nrm(next(keys), (EMBED, 3 * EMBED))
        bqkv = jnp.zeros((3 * EMBED,), jnp.float32)
        # fold the 1/sqrt(head_dim) attention scale into the Q projection
        wqkv = wqkv.at[:, :EMBED].multiply(attn_scale)
        bqkv = bqkv.at[:EMBED].multiply(attn_scale)

        wo = nrm(next(keys), (EMBED, EMBED))
        w1 = nrm(next(keys), (EMBED, HIDDEN))
        w2 = nrm(next(keys), (HIDDEN, EMBED))

        vec = jnp.stack([
            bqkv,                                          # R_BQKV
            padded_row(jnp.zeros((EMBED,), jnp.float32)),  # R_BO
            padded_row(jnp.ones((EMBED,), jnp.float32)),   # R_LN1G
            padded_row(jnp.zeros((EMBED,), jnp.float32)),  # R_LN1B
            padded_row(jnp.zeros((HIDDEN,), jnp.float32)), # R_B1
            padded_row(jnp.zeros((EMBED,), jnp.float32)),  # R_B2
            padded_row(jnp.ones((EMBED,), jnp.float32)),   # R_LN2G
            padded_row(jnp.zeros((EMBED,), jnp.float32)),  # R_LN2B
        ], axis=0)

        wqkv_l.append(wqkv); wo_l.append(wo)
        w1_l.append(w1); w2_l.append(w2); vec_l.append(vec)

    return {
        "embedding": embedding,
        "wqkv": jnp.stack(wqkv_l),   # (L, E, 3E)
        "wo":   jnp.stack(wo_l),     # (L, E, E)
        "w1":   jnp.stack(w1_l),     # (L, E, HIDDEN)
        "w2":   jnp.stack(w2_l),     # (L, HIDDEN, E)
        "vecs": jnp.stack(vec_l),    # (L, 8, 3E) packed biases / LN params
        "wfc": wfc, "bfc": bfc,
    }


# NOTE: the PyTorch module defines `self.self_attention` but never uses it in
# forward(), so it is intentionally omitted here.
# TODO(synk): dropout is implemented as identity (inference mode only).

if __name__ == "__main__":
    key = jax.random.PRNGKey(0)
    k_ids, k_par = jax.random.split(key)
    ids = jax.random.randint(k_ids, (BATCH, SEQ), 0, VOCAB, dtype=jnp.int32)
    params = init_params(k_par)

    out = jax.jit(forward)(ids, params)
    out = jax.block_until_ready(out)

    assert out.shape == (BATCH, NUM_CLASSES)
    assert bool(jnp.all(jnp.abs(jnp.sum(out, axis=1) - 1.0) < 1e-4))
    print("KERNEL_OK")
</pallas_src>

<mosaic_0001>
module attributes {stable_mosaic.version = 11 : i64} {
  func.func @fused_forward_kernel(%arg0: memref<16x32xf32, #tpu.memory_space<vmem>>, %arg1: memref<2x32x96xf32, #tpu.memory_space<vmem>>, %arg2: memref<2x32x32xf32, #tpu.memory_space<vmem>>, %arg3: memref<2x32x64xf32, #tpu.memory_space<vmem>>, %arg4: memref<2x64x32xf32, #tpu.memory_space<vmem>>, %arg5: memref<2x8x96xf32, #tpu.memory_space<vmem>>, %arg6: memref<32x8xf32, #tpu.memory_space<vmem>>, %arg7: memref<1x8xf32, #tpu.memory_space<vmem>>, %arg8: memref<2x8xf32, #tpu.memory_space<vmem>>) attributes {dimension_semantics = [], scalar_prefetch = 0 : i64, scratch_operands = 0 : i64, tpu.core_type = #tpu.core_type<tc>} {
    %c0 = arith.constant 0 : index
    %c0_0 = arith.constant 0 : index
    %0 = vector.load %arg0[%c0, %c0_0] : memref<16x32xf32, #tpu.memory_space<vmem>>, vector<16x32xf32>
    %c0_1 = arith.constant 0 : index
    %c0_2 = arith.constant 0 : index
    %c0_3 = arith.constant 0 : index
    %1 = vector.load %arg1[%c0_1, %c0_2, %c0_3] : memref<2x32x96xf32, #tpu.memory_space<vmem>>, vector<1x32x96xf32>
    %2 = vector.shape_cast %1 : vector<1x32x96xf32> to vector<32x96xf32>
    %c0_4 = arith.constant 0 : index
    %c0_5 = arith.constant 0 : index
    %c0_6 = arith.constant 0 : index
    %3 = vector.load %arg2[%c0_4, %c0_5, %c0_6] : memref<2x32x32xf32, #tpu.memory_space<vmem>>, vector<1x32x32xf32>
    %4 = vector.shape_cast %3 : vector<1x32x32xf32> to vector<32x32xf32>
    %c0_7 = arith.constant 0 : index
    %c0_8 = arith.constant 0 : index
    %c0_9 = arith.constant 0 : index
    %5 = vector.load %arg3[%c0_7, %c0_8, %c0_9] : memref<2x32x64xf32, #tpu.memory_space<vmem>>, vector<1x32x64xf32>
    %6 = vector.shape_cast %5 : vector<1x32x64xf32> to vector<32x64xf32>
    %c0_10 = arith.constant 0 : index
    %c0_11 = arith.constant 0 : index
    %c0_12 = arith.constant 0 : index
    %7 = vector.load %arg4[%c0_10, %c0_11, %c0_12] : memref<2x64x32xf32, #tpu.memory_space<vmem>>, vector<1x64x32xf32>
    %8 = vector.shape_cast %7 : vector<1x64x32xf32> to vector<64x32xf32>
    %c0_13 = arith.constant 0 : index
    %c0_14 = arith.constant 0 : index
    %c0_15 = arith.constant 0 : index
    %9 = vector.load %arg5[%c0_13, %c0_14, %c0_15] : memref<2x8x96xf32, #tpu.memory_space<vmem>>, vector<1x8x96xf32>
    %10 = vector.shape_cast %9 : vector<1x8x96xf32> to vector<8x96xf32>
    %cst = arith.constant dense<0.000000e+00> : vector<16x96xf32>
    %11 = tpu.matmul %0, %2, %cst {dimension_numbers = #tpu.dot_dimension_numbers<[1], [0], [0], [1], [0, 0, 1, 1], [], []>} : vector<16x32xf32>, vector<32x96xf32>, vector<16x96xf32> -> vector<16x96xf32>
    %12 = vector.extract_strided_slice %10 {offsets = [0, 0], sizes = [1, 96], strides = [1, 1]} : vector<8x96xf32> to vector<1x96xf32>
    %13 = vector.broadcast %12 : vector<1x96xf32> to vector<16x96xf32>
    %14 = arith.addf %11, %13 : vector<16x96xf32>
    %cst_16 = arith.constant 0.000000e+00 : f32
    %15 = vector.broadcast %cst_16 : f32 to vector<16x32xf32>
    %16 = vector.extract_strided_slice %14 {offsets = [0, 0], sizes = [16, 8], strides = [1, 1]} : vector<16x96xf32> to vector<16x8xf32>
    %17 = vector.shape_cast %16 : vector<16x8xf32> to vector<2x8x8xf32>
    %18 = vector.extract_strided_slice %14 {offsets = [0, 32], sizes = [16, 8], strides = [1, 1]} : vector<16x96xf32> to vector<16x8xf32>
    %19 = vector.shape_cast %18 : vector<16x8xf32> to vector<2x8x8xf32>
    %20 = vector.extract_strided_slice %14 {offsets = [0, 64], sizes = [16, 8], strides = [1, 1]} : vector<16x96xf32> to vector<16x8xf32>
    %21 = vector.shape_cast %20 : vector<16x8xf32> to vector<2x8x8xf32>
    "tpu.trace_start"() <{level = 10 : i32, message = "bqd,bkd->bqk"}> : () -> ()
    %cst_17 = arith.constant dense<0.000000e+00> : vector<2x8x8xf32>
    %22 = tpu.matmul %17, %19, %cst_17 {dimension_numbers = #tpu.dot_dimension_numbers<[2], [2], [1], [1], [0, 0, 0, 1, 1, 1], [0], [0]>} : vector<2x8x8xf32>, vector<2x8x8xf32>, vector<2x8x8xf32> -> vector<2x8x8xf32>
    "tpu.trace_stop"() : () -> ()
    %cst_18 = arith.constant dense<0xFF800000> : vector<2x8xf32>
    %23 = vector.multi_reduction <maximumf>, %22, %cst_18 [2] : vector<2x8x8xf32> to vector<2x8xf32>
    %24 = vector.shape_cast %23 : vector<2x8xf32> to vector<2x8x1xf32>
    %25 = vector.broadcast %24 : vector<2x8x1xf32> to vector<2x8x8xf32>
    %26 = arith.subf %22, %25 : vector<2x8x8xf32>
    %27 = math.exp %26 : vector<2x8x8xf32>
    %cst_19 = arith.constant dense<0.000000e+00> : vector<2x8xf32>
    %28 = vector.multi_reduction <add>, %27, %cst_19 [2] : vector<2x8x8xf32> to vector<2x8xf32>
    %29 = vector.shape_cast %28 : vector<2x8xf32> to vector<2x8x1xf32>
    %30 = tpu.reciprocal %29 {approx = true} : vector<2x8x1xf32> -> vector<2x8x1xf32>
    %31 = vector.broadcast %30 : vector<2x8x1xf32> to vector<2x8x8xf32>
    %32 = arith.mulf %27, %31 : vector<2x8x8xf32>
    "tpu.trace_start"() <{level = 10 : i32, message = "bqk,bkd->bqd"}> : () -> ()
    %cst_20 = arith.constant dense<0.000000e+00> : vector<2x8x8xf32>
    %33 = tpu.matmul %32, %21, %cst_20 {dimension_numbers = #tpu.dot_dimension_numbers<[2], [1], [1], [2], [0, 0, 0, 1, 1, 2], [0], [0]>} : vector<2x8x8xf32>, vector<2x8x8xf32>, vector<2x8x8xf32> -> vector<2x8x8xf32>
    "tpu.trace_stop"() : () -> ()
    %34 = vector.shape_cast %33 : vector<2x8x8xf32> to vector<16x8xf32>
    %35 = vector.extract_strided_slice %4 {offsets = [0, 0], sizes = [8, 32], strides = [1, 1]} : vector<32x32xf32> to vector<8x32xf32>
    %cst_21 = arith.constant dense<0.000000e+00> : vector<16x32xf32>
    %36 = tpu.matmul %34, %35, %cst_21 {dimension_numbers = #tpu.dot_dimension_numbers<[1], [0], [0], [1], [0, 0, 1, 1], [], []>} : vector<16x8xf32>, vector<8x32xf32>, vector<16x32xf32> -> vector<16x32xf32>
    %37 = arith.addf %15, %36 : vector<16x32xf32>
    %38 = vector.extract_strided_slice %14 {offsets = [0, 8], sizes = [16, 8], strides = [1, 1]} : vector<16x96xf32> to vector<16x8xf32>
    %39 = vector.shape_cast %38 : vector<16x8xf32> to vector<2x8x8xf32>
    %40 = vector.extract_strided_slice %14 {offsets = [0, 40], sizes = [16, 8], strides = [1, 1]} : vector<16x96xf32> to vector<16x8xf32>
    %41 = vector.shape_cast %40 : vector<16x8xf32> to vector<2x8x8xf32>
    %42 = vector.extract_strided_slice %14 {offsets = [0, 72], sizes = [16, 8], strides = [1, 1]} : vector<16x96xf32> to vector<16x8xf32>
    %43 = vector.shape_cast %42 : vector<16x8xf32> to vector<2x8x8xf32>
    "tpu.trace_start"() <{level = 10 : i32, message = "bqd,bkd->bqk"}> : () -> ()
    %cst_22 = arith.constant dense<0.000000e+00> : vector<2x8x8xf32>
    %44 = tpu.matmul %39, %41, %cst_22 {dimension_numbers = #tpu.dot_dimension_numbers<[2], [2], [1], [1], [0, 0, 0, 1, 1, 1], [0], [0]>} : vector<2x8x8xf32>, vector<2x8x8xf32>, vector<2x8x8xf32> -> vector<2x8x8xf32>
    "tpu.trace_stop"() : () -> ()
    %cst_23 = arith.constant dense<0xFF800000> : vector<2x8xf32>
    %45 = vector.multi_reduction <maximumf>, %44, %cst_23 [2] : vector<2x8x8xf32> to vector<2x8xf32>
    %46 = vector.shape_cast %45 : vector<2x8xf32> to vector<2x8x1xf32>
    %47 = vector.broadcast %46 : vector<2x8x1xf32> to vector<2x8x8xf32>
    %48 = arith.subf %44, %47 : vector<2x8x8xf32>
    %49 = math.exp %48 : vector<2x8x8xf32>
    %cst_24 = arith.constant dense<0.000000e+00> : vector<2x8xf32>
    %50 = vector.multi_reduction <add>, %49, %cst_24 [2] : vector<2x8x8xf32> to vector<2x8xf32>
    %51 = vector.shape_cast %50 : vector<2x8xf32> to vector<2x8x1xf32>
    %52 = tpu.reciprocal %51 {approx = true} : vector<2x8x1xf32> -> vector<2x8x1xf32>
    %53 = vector.broadcast %52 : vector<2x8x1xf32> to vector<2x8x8xf32>
    %54 = arith.mulf %49, %53 : vector<2x8x8xf32>
    "tpu.trace_start"() <{level = 10 : i32, message = "bqk,bkd->bqd"}> : () -> ()
    %cst_25 = arith.constant dense<0.000000e+00> : vector<2x8x8xf32>
    %55 = tpu.matmul %54, %43, %cst_25 {dimension_numbers = #tpu.dot_dimension_numbers<[2], [1], [1], [2], [0, 0, 0, 1, 1, 2], [0], [0]>} : vector<2x8x8xf32>, vector<2x8x8xf32>, vector<2x8x8xf32> -> vector<2x8x8xf32>
    "tpu.trace_stop"() : () -> ()
    %56 = vector.shape_cast %55 : vector<2x8x8xf32> to vector<16x8xf32>
    %57 = vector.extract_strided_slice %4 {offsets = [8, 0], sizes = [8, 32], strides = [1, 1]} : vector<32x32xf32> to vector<8x32xf32>
    %cst_26 = arith.constant dense<0.000000e+00> : vector<16x32xf32>
    %58 = tpu.matmul %56, %57, %cst_26 {dimension_numbers = #tpu.dot_dimension_numbers<[1], [0], [0], [1], [0, 0, 1, 1], [], []>} : vector<16x8xf32>, vector<8x32xf32>, vector<16x32xf32> -> vector<16x32xf32>
    %59 = arith.addf %37, %58 : vector<16x32xf32>
    %60 = vector.extract_strided_slice %14 {offsets = [0, 16], sizes = [16, 8], strides = [1, 1]} : vector<16x96xf32> to vector<16x8xf32>
    %61 = vector.shape_cast %60 : vector<16x8xf32> to vector<2x8x8xf32>
    %62 = vector.extract_strided_slice %14 {offsets = [0, 48], sizes = [16, 8], strides = [1, 1]} : vector<16x96xf32> to vector<16x8xf32>
    %63 = vector.shape_cast %62 : vector<16x8xf32> to vector<2x8x8xf32>
    %64 = vector.extract_strided_slice %14 {offsets = [0, 80], sizes = [16, 8], strides = [1, 1]} : vector<16x96xf32> to vector<16x8xf32>
    %65 = vector.shape_cast %64 : vector<16x8xf32> to vector<2x8x8xf32>
    "tpu.trace_start"() <{level = 10 : i32, message = "bqd,bkd->bqk"}> : () -> ()
    %cst_27 = arith.constant dense<0.000000e+00> : vector<2x8x8xf32>
    %66 = tpu.matmul %61, %63, %cst_27 {dimension_numbers = #tpu.dot_dimension_numbers<[2], [2], [1], [1], [0, 0, 0, 1, 1, 1], [0], [0]>} : vector<2x8x8xf32>, vector<2x8x8xf32>, vector<2x8x8xf32> -> vector<2x8x8xf32>
    "tpu.trace_stop"() : () -> ()
    %cst_28 = arith.constant dense<0xFF800000> : vector<2x8xf32>
    %67 = vector.multi_reduction <maximumf>, %66, %cst_28 [2] : vector<2x8x8xf32> to vector<2x8xf32>
    %68 = vector.shape_cast %67 : vector<2x8xf32> to vector<2x8x1xf32>
    %69 = vector.broadcast %68 : vector<2x8x1xf32> to vector<2x8x8xf32>
    %70 = arith.subf %66, %69 : vector<2x8x8xf32>
    %71 = math.exp %70 : vector<2x8x8xf32>
    %cst_29 = arith.constant dense<0.000000e+00> : vector<2x8xf32>
    %72 = vector.multi_reduction <add>, %71, %cst_29 [2] : vector<2x8x8xf32> to vector<2x8xf32>
    %73 = vector.shape_cast %72 : vector<2x8xf32> to vector<2x8x1xf32>
    %74 = tpu.reciprocal %73 {approx = true} : vector<2x8x1xf32> -> vector<2x8x1xf32>
    %75 = vector.broadcast %74 : vector<2x8x1xf32> to vector<2x8x8xf32>
    %76 = arith.mulf %71, %75 : vector<2x8x8xf32>
    "tpu.trace_start"() <{level = 10 : i32, message = "bqk,bkd->bqd"}> : () -> ()
    %cst_30 = arith.constant dense<0.000000e+00> : vector<2x8x8xf32>
    %77 = tpu.matmul %76, %65, %cst_30 {dimension_numbers = #tpu.dot_dimension_numbers<[2], [1], [1], [2], [0, 0, 0, 1, 1, 2], [0], [0]>} : vector<2x8x8xf32>, vector<2x8x8xf32>, vector<2x8x8xf32> -> vector<2x8x8xf32>
    "tpu.trace_stop"() : () -> ()
    %78 = vector.shape_cast %77 : vector<2x8x8xf32> to vector<16x8xf32>
    %79 = vector.extract_strided_slice %4 {offsets = [16, 0], sizes = [8, 32], strides = [1, 1]} : vector<32x32xf32> to vector<8x32xf32>
    %cst_31 = arith.constant dense<0.000000e+00> : vector<16x32xf32>
    %80 = tpu.matmul %78, %79, %cst_31 {dimension_numbers = #tpu.dot_dimension_numbers<[1], [0], [0], [1], [0, 0, 1, 1], [], []>} : vector<16x8xf32>, vector<8x32xf32>, vector<16x32xf32> -> vector<16x32xf32>
    %81 = arith.addf %59, %80 : vector<16x32xf32>
    %82 = vector.extract_strided_slice %14 {offsets = [0, 24], sizes = [16, 8], strides = [1, 1]} : vector<16x96xf32> to vector<16x8xf32>
    %83 = vector.shape_cast %82 : vector<16x8xf32> to vector<2x8x8xf32>
    %84 = vector.extract_strided_slice %14 {offsets = [0, 56], sizes = [16, 8], strides = [1, 1]} : vector<16x96xf32> to vector<16x8xf32>
    %85 = vector.shape_cast %84 : vector<16x8xf32> to vector<2x8x8xf32>
    %86 = vector.extract_strided_slice %14 {offsets = [0, 88], sizes = [16, 8], strides = [1, 1]} : vector<16x96xf32> to vector<16x8xf32>
    %87 = vector.shape_cast %86 : vector<16x8xf32> to vector<2x8x8xf32>
    "tpu.trace_start"() <{level = 10 : i32, message = "bqd,bkd->bqk"}> : () -> ()
    %cst_32 = arith.constant dense<0.000000e+00> : vector<2x8x8xf32>
    %88 = tpu.matmul %83, %85, %cst_32 {dimension_numbers = #tpu.dot_dimension_numbers<[2], [2], [1], [1], [0, 0, 0, 1, 1, 1], [0], [0]>} : vector<2x8x8xf32>, vector<2x8x8xf32>, vector<2x8x8xf32> -> vector<2x8x8xf32>
    "tpu.trace_stop"() : () -> ()
    %cst_33 = arith.constant dense<0xFF800000> : vector<2x8xf32>
    %89 = vector.multi_reduction <maximumf>, %88, %cst_33 [2] : vector<2x8x8xf32> to vector<2x8xf32>
    %90 = vector.shape_cast %89 : vector<2x8xf32> to vector<2x8x1xf32>
    %91 = vector.broadcast %90 : vector<2x8x1xf32> to vector<2x8x8xf32>
    %92 = arith.subf %88, %91 : vector<2x8x8xf32>
    %93 = math.exp %92 : vector<2x8x8xf32>
    %cst_34 = arith.constant dense<0.000000e+00> : vector<2x8xf32>
    %94 = vector.multi_reduction <add>, %93, %cst_34 [2] : vector<2x8x8xf32> to vector<2x8xf32>
    %95 = vector.shape_cast %94 : vector<2x8xf32> to vector<2x8x1xf32>
    %96 = tpu.reciprocal %95 {approx = true} : vector<2x8x1xf32> -> vector<2x8x1xf32>
    %97 = vector.broadcast %96 : vector<2x8x1xf32> to vector<2x8x8xf32>
    %98 = arith.mulf %93, %97 : vector<2x8x8xf32>
    "tpu.trace_start"() <{level = 10 : i32, message = "bqk,bkd->bqd"}> : () -> ()
    %cst_35 = arith.constant dense<0.000000e+00> : vector<2x8x8xf32>
    %99 = tpu.matmul %98, %87, %cst_35 {dimension_numbers = #tpu.dot_dimension_numbers<[2], [1], [1], [2], [0, 0, 0, 1, 1, 2], [0], [0]>} : vector<2x8x8xf32>, vector<2x8x8xf32>, vector<2x8x8xf32> -> vector<2x8x8xf32>
    "tpu.trace_stop"() : () -> ()
    %100 = vector.shape_cast %99 : vector<2x8x8xf32> to vector<16x8xf32>
    %101 = vector.extract_strided_slice %4 {offsets = [24, 0], sizes = [8, 32], strides = [1, 1]} : vector<32x32xf32> to vector<8x32xf32>
    %cst_36 = arith.constant dense<0.000000e+00> : vector<16x32xf32>
    %102 = tpu.matmul %100, %101, %cst_36 {dimension_numbers = #tpu.dot_dimension_numbers<[1], [0], [0], [1], [0, 0, 1, 1], [], []>} : vector<16x8xf32>, vector<8x32xf32>, vector<16x32xf32> -> vector<16x32xf32>
    %103 = arith.addf %81, %102 : vector<16x32xf32>
    %104 = vector.extract_strided_slice %10 {offsets = [1, 0], sizes = [1, 32], strides = [1, 1]} : vector<8x96xf32> to vector<1x32xf32>
    %105 = vector.broadcast %104 : vector<1x32xf32> to vector<16x32xf32>
    %106 = arith.addf %103, %105 : vector<16x32xf32>
    %107 = arith.addf %0, %106 : vector<16x32xf32>
    %108 = vector.extract_strided_slice %10 {offsets = [2, 0], sizes = [1, 32], strides = [1, 1]} : vector<8x96xf32> to vector<1x32xf32>
    %109 = vector.extract_strided_slice %10 {offsets = [3, 0], sizes = [1, 32], strides = [1, 1]} : vector<8x96xf32> to vector<1x32xf32>
    %cst_37 = arith.constant dense<0.000000e+00> : vector<16xf32>
    %110 = vector.multi_reduction <add>, %107, %cst_37 [1] : vector<16x32xf32> to vector<16xf32>
    %111 = vector.shape_cast %110 : vector<16xf32> to vector<16x1xf32>
    %cst_38 = arith.constant 3.200000e+01 : f32
    %112 = vector.broadcast %cst_38 : f32 to vector<16x1xf32>
    %113 = arith.divf %111, %112 : vector<16x1xf32>
    %114 = vector.broadcast %113 : vector<16x1xf32> to vector<16x32xf32>
    %115 = arith.subf %107, %114 : vector<16x32xf32>
    %116 = arith.mulf %115, %115 : vector<16x32xf32>
    %cst_39 = arith.constant dense<0.000000e+00> : vector<16xf32>
    %117 = vector.multi_reduction <add>, %116, %cst_39 [1] : vector<16x32xf32> to vector<16xf32>
    %118 = vector.shape_cast %117 : vector<16xf32> to vector<16x1xf32>
    %cst_40 = arith.constant 3.200000e+01 : f32
    %119 = vector.broadcast %cst_40 : f32 to vector<16x1xf32>
    %120 = arith.divf %118, %119 : vector<16x1xf32>
    %121 = vector.broadcast %113 : vector<16x1xf32> to vector<16x32xf32>
    %122 = arith.subf %107, %121 : vector<16x32xf32>
    %cst_41 = arith.constant 9.99999974E-6 : f32
    %123 = vector.broadcast %cst_41 : f32 to vector<16x1xf32>
    %124 = arith.addf %120, %123 : vector<16x1xf32>
    %125 = math.rsqrt %124 : vector<16x1xf32>
    %126 = vector.broadcast %125 : vector<16x1xf32> to vector<16x32xf32>
    %127 = arith.mulf %122, %126 : vector<16x32xf32>
    %128 = vector.broadcast %108 : vector<1x32xf32> to vector<16x32xf32>
    %129 = arith.mulf %127, %128 : vector<16x32xf32>
    %130 = vector.broadcast %109 : vector<1x32xf32> to vector<16x32xf32>
    %131 = arith.addf %129, %130 : vector<16x32xf32>
    %cst_42 = arith.constant dense<0.000000e+00> : vector<16x64xf32>
    %132 = tpu.matmul %131, %6, %cst_42 {dimension_numbers = #tpu.dot_dimension_numbers<[1], [0], [0], [1], [0, 0, 1, 1], [], []>} : vector<16x32xf32>, vector<32x64xf32>, vector<16x64xf32> -> vector<16x64xf32>
    %133 = vector.extract_strided_slice %10 {offsets = [4, 0], sizes = [1, 64], strides = [1, 1]} : vector<8x96xf32> to vector<1x64xf32>
    %134 = vector.broadcast %133 : vector<1x64xf32> to vector<16x64xf32>
    %135 = arith.addf %132, %134 : vector<16x64xf32>
    %cst_43 = arith.constant 0.000000e+00 : f32
    %136 = vector.broadcast %cst_43 : f32 to vector<16x64xf32>
    %137 = arith.maximumf %135, %136 : vector<16x64xf32>
    %cst_44 = arith.constant dense<0.000000e+00> : vector<16x32xf32>
    %138 = tpu.matmul %137, %8, %cst_44 {dimension_numbers = #tpu.dot_dimension_numbers<[1], [0], [0], [1], [0, 0, 1, 1], [], []>} : vector<16x64xf32>, vector<64x32xf32>, vector<16x32xf32> -> vector<16x32xf32>
    %139 = vector.extract_strided_slice %10 {offsets = [5, 0], sizes = [1, 32], strides = [1, 1]} : vector<8x96xf32> to vector<1x32xf32>
    %140 = vector.broadcast %139 : vector<1x32xf32> to vector<16x32xf32>
    %141 = arith.addf %138, %140 : vector<16x32xf32>
    %142 = arith.addf %131, %141 : vector<16x32xf32>
    %143 = vector.extract_strided_slice %10 {offsets = [6, 0], sizes = [1, 32], strides = [1, 1]} : vector<8x96xf32> to vector<1x32xf32>
    %144 = vector.extract_strided_slice %10 {offsets = [7, 0], sizes = [1, 32], strides = [1, 1]} : vector<8x96xf32> to vector<1x32xf32>
    %cst_45 = arith.constant dense<0.000000e+00> : vector<16xf32>
    %145 = vector.multi_reduction <add>, %142, %cst_45 [1] : vector<16x32xf32> to vector<16xf32>
    %146 = vector.shape_cast %145 : vector<16xf32> to vector<16x1xf32>
    %cst_46 = arith.constant 3.200000e+01 : f32
    %147 = vector.broadcast %cst_46 : f32 to vector<16x1xf32>
    %148 = arith.divf %146, %147 : vector<16x1xf32>
    %149 = vector.broadcast %148 : vector<16x1xf32> to vector<16x32xf32>
    %150 = arith.subf %142, %149 : vector<16x32xf32>
    %151 = arith.mulf %150, %150 : vector<16x32xf32>
    %cst_47 = arith.constant dense<0.000000e+00> : vector<16xf32>
    %152 = vector.multi_reduction <add>, %151, %cst_47 [1] : vector<16x32xf32> to vector<16xf32>
    %153 = vector.shape_cast %152 : vector<16xf32> to vector<16x1xf32>
    %cst_48 = arith.constant 3.200000e+01 : f32
    %154 = vector.broadcast %cst_48 : f32 to vector<16x1xf32>
    %155 = arith.divf %153, %154 : vector<16x1xf32>
    %156 = vector.broadcast %148 : vector<16x1xf32> to vector<16x32xf32>
    %157 = arith.subf %142, %156 : vector<16x32xf32>
    %cst_49 = arith.constant 9.99999974E-6 : f32
    %158 = vector.broadcast %cst_49 : f32 to vector<16x1xf32>
    %159 = arith.addf %155, %158 : vector<16x1xf32>
    %160 = math.rsqrt %159 : vector<16x1xf32>
    %161 = vector.broadcast %160 : vector<16x1xf32> to vector<16x32xf32>
    %162 = arith.mulf %157, %161 : vector<16x32xf32>
    %163 = vector.broadcast %143 : vector<1x32xf32> to vector<16x32xf32>
    %164 = arith.mulf %162, %163 : vector<16x32xf32>
    %165 = vector.broadcast %144 : vector<1x32xf32> to vector<16x32xf32>
    %166 = arith.addf %164, %165 : vector<16x32xf32>
    %c1 = arith.constant 1 : index
    %c0_50 = arith.constant 0 : index
    %c0_51 = arith.constant 0 : index
    %167 = vector.load %arg1[%c1, %c0_50, %c0_51] : memref<2x32x96xf32, #tpu.memory_space<vmem>>, vector<1x32x96xf32>
    %168 = vector.shape_cast %167 : vector<1x32x96xf32> to vector<32x96xf32>
    %c1_52 = arith.constant 1 : index
    %c0_53 = arith.constant 0 : index
    %c0_54 = arith.constant 0 : index
    %169 = vector.load %arg2[%c1_52, %c0_53, %c0_54] : memref<2x32x32xf32, #tpu.memory_space<vmem>>, vector<1x32x32xf32>
    %170 = vector.shape_cast %169 : vector<1x32x32xf32> to vector<32x32xf32>
    %c1_55 = arith.constant 1 : index
    %c0_56 = arith.constant 0 : index
    %c0_57 = arith.constant 0 : index
    %171 = vector.load %arg3[%c1_55, %c0_56, %c0_57] : memref<2x32x64xf32, #tpu.memory_space<vmem>>, vector<1x32x64xf32>
    %172 = vector.shape_cast %171 : vector<1x32x64xf32> to vector<32x64xf32>
    %c1_58 = arith.constant 1 : index
    %c0_59 = arith.constant 0 : index
    %c0_60 = arith.constant 0 : index
    %173 = vector.load %arg4[%c1_58, %c0_59, %c0_60] : memref<2x64x32xf32, #tpu.memory_space<vmem>>, vector<1x64x32xf32>
    %174 = vector.shape_cast %173 : vector<1x64x32xf32> to vector<64x32xf32>
    %c1_61 = arith.constant 1 : index
    %c0_62 = arith.constant 0 : index
    %c0_63 = arith.constant 0 : index
    %175 = vector.load %arg5[%c1_61, %c0_62, %c0_63] : memref<2x8x96xf32, #tpu.memory_space<vmem>>, vector<1x8x96xf32>
    %176 = vector.shape_cast %175 : vector<1x8x96xf32> to vector<8x96xf32>
    %cst_64 = arith.constant dense<0.000000e+00> : vector<16x96xf32>
    %177 = tpu.matmul %166, %168, %cst_64 {dimension_numbers = #tpu.dot_dimension_numbers<[1], [0], [0], [1], [0, 0, 1, 1], [], []>} : vector<16x32xf32>, vector<32x96xf32>, vector<16x96xf32> -> vector<16x96xf32>
    %178 = vector.extract_strided_slice %176 {offsets = [0, 0], sizes = [1, 96], strides = [1, 1]} : vector<8x96xf32> to vector<1x96xf32>
    %179 = vector.broadcast %178 : vector<1x96xf32> to vector<16x96xf32>
    %180 = arith.addf %177, %179 : vector<16x96xf32>
    %cst_65 = arith.constant 0.000000e+00 : f32
    %181 = vector.broadcast %cst_65 : f32 to vector<16x32xf32>
    %182 = vector.extract_strided_slice %180 {offsets = [0, 0], sizes = [16, 8], strides = [1, 1]} : vector<16x96xf32> to vector<16x8xf32>
    %183 = vector.shape_cast %182 : vector<16x8xf32> to vector<2x8x8xf32>
    %184 = vector.extract_strided_slice %180 {offsets = [0, 32], sizes = [16, 8], strides = [1, 1]} : vector<16x96xf32> to vector<16x8xf32>
    %185 = vector.shape_cast %184 : vector<16x8xf32> to vector<2x8x8xf32>
    %186 = vector.extract_strided_slice %180 {offsets = [0, 64], sizes = [16, 8], strides = [1, 1]} : vector<16x96xf32> to vector<16x8xf32>
    %187 = vector.shape_cast %186 : vector<16x8xf32> to vector<2x8x8xf32>
    "tpu.trace_start"() <{level = 10 : i32, message = "bqd,bkd->bqk"}> : () -> ()
    %cst_66 = arith.constant dense<0.000000e+00> : vector<2x8x8xf32>
    %188 = tpu.matmul %183, %185, %cst_66 {dimension_numbers = #tpu.dot_dimension_numbers<[2], [2], [1], [1], [0, 0, 0, 1, 1, 1], [0], [0]>} : vector<2x8x8xf32>, vector<2x8x8xf32>, vector<2x8x8xf32> -> vector<2x8x8xf32>
    "tpu.trace_stop"() : () -> ()
    %cst_67 = arith.constant dense<0xFF800000> : vector<2x8xf32>
    %189 = vector.multi_reduction <maximumf>, %188, %cst_67 [2] : vector<2x8x8xf32> to vector<2x8xf32>
    %190 = vector.shape_cast %189 : vector<2x8xf32> to vector<2x8x1xf32>
    %191 = vector.broadcast %190 : vector<2x8x1xf32> to vector<2x8x8xf32>
    %192 = arith.subf %188, %191 : vector<2x8x8xf32>
    %193 = math.exp %192 : vector<2x8x8xf32>
    %cst_68 = arith.constant dense<0.000000e+00> : vector<2x8xf32>
    %194 = vector.multi_reduction <add>, %193, %cst_68 [2] : vector<2x8x8xf32> to vector<2x8xf32>
    %195 = vector.shape_cast %194 : vector<2x8xf32> to vector<2x8x1xf32>
    %196 = tpu.reciprocal %195 {approx = true} : vector<2x8x1xf32> -> vector<2x8x1xf32>
    %197 = vector.broadcast %196 : vector<2x8x1xf32> to vector<2x8x8xf32>
    %198 = arith.mulf %193, %197 : vector<2x8x8xf32>
    "tpu.trace_start"() <{level = 10 : i32, message = "bqk,bkd->bqd"}> : () -> ()
    %cst_69 = arith.constant dense<0.000000e+00> : vector<2x8x8xf32>
    %199 = tpu.matmul %198, %187, %cst_69 {dimension_numbers = #tpu.dot_dimension_numbers<[2], [1], [1], [2], [0, 0, 0, 1, 1, 2], [0], [0]>} : vector<2x8x8xf32>, vector<2x8x8xf32>, vector<2x8x8xf32> -> vector<2x8x8xf32>
    "tpu.trace_stop"() : () -> ()
    %200 = vector.shape_cast %199 : vector<2x8x8xf32> to vector<16x8xf32>
    %201 = vector.extract_strided_slice %170 {offsets = [0, 0], sizes = [8, 32], strides = [1, 1]} : vector<32x32xf32> to vector<8x32xf32>
    %cst_70 = arith.constant dense<0.000000e+00> : vector<16x32xf32>
    %202 = tpu.matmul %200, %201, %cst_70 {dimension_numbers = #tpu.dot_dimension_numbers<[1], [0], [0], [1], [0, 0, 1, 1], [], []>} : vector<16x8xf32>, vector<8x32xf32>, vector<16x32xf32> -> vector<16x32xf32>
    %203 = arith.addf %181, %202 : vector<16x32xf32>
    %204 = vector.extract_strided_slice %180 {offsets = [0, 8], sizes = [16, 8], strides = [1, 1]} : vector<16x96xf32> to vector<16x8xf32>
    %205 = vector.shape_cast %204 : vector<16x8xf32> to vector<2x8x8xf32>
    %206 = vector.extract_strided_slice %180 {offsets = [0, 40], sizes = [16, 8], strides = [1, 1]} : vector<16x96xf32> to vector<16x8xf32>
    %207 = vector.shape_cast %206 : vector<16x8xf32> to vector<2x8x8xf32>
    %208 = vector.extract_strided_slice %180 {offsets = [0, 72], sizes = [16, 8], strides = [1, 1]} : vector<16x96xf32> to vector<16x8xf32>
    %209 = vector.shape_cast %208 : vector<16x8xf32> to vector<2x8x8xf32>
    "tpu.trace_start"() <{level = 10 : i32, message = "bqd,bkd->bqk"}> : () -> ()
    %cst_71 = arith.constant dense<0.000000e+00> : vector<2x8x8xf32>
    %210 = tpu.matmul %205, %207, %cst_71 {dimension_numbers = #tpu.dot_dimension_numbers<[2], [2], [1], [1], [0, 0, 0, 1, 1, 1], [0], [0]>} : vector<2x8x8xf32>, vector<2x8x8xf32>, vector<2x8x8xf32> -> vector<2x8x8xf32>
    "tpu.trace_stop"() : () -> ()
    %cst_72 = arith.constant dense<0xFF800000> : vector<2x8xf32>
    %211 = vector.multi_reduction <maximumf>, %210, %cst_72 [2] : vector<2x8x8xf32> to vector<2x8xf32>
    %212 = vector.shape_cast %211 : vector<2x8xf32> to vector<2x8x1xf32>
    %213 = vector.broadcast %212 : vector<2x8x1xf32> to vector<2x8x8xf32>
    %214 = arith.subf %210, %213 : vector<2x8x8xf32>
    %215 = math.exp %214 : vector<2x8x8xf32>
    %cst_73 = arith.constant dense<0.000000e+00> : vector<2x8xf32>
    %216 = vector.multi_reduction <add>, %215, %cst_73 [2] : vector<2x8x8xf32> to vector<2x8xf32>
    %217 = vector.shape_cast %216 : vector<2x8xf32> to vector<2x8x1xf32>
    %218 = tpu.reciprocal %217 {approx = true} : vector<2x8x1xf32> -> vector<2x8x1xf32>
    %219 = vector.broadcast %218 : vector<2x8x1xf32> to vector<2x8x8xf32>
    %220 = arith.mulf %215, %219 : vector<2x8x8xf32>
    "tpu.trace_start"() <{level = 10 : i32, message = "bqk,bkd->bqd"}> : () -> ()
    %cst_74 = arith.constant dense<0.000000e+00> : vector<2x8x8xf32>
    %221 = tpu.matmul %220, %209, %cst_74 {dimension_numbers = #tpu.dot_dimension_numbers<[2], [1], [1], [2], [0, 0, 0, 1, 1, 2], [0], [0]>} : vector<2x8x8xf32>, vector<2x8x8xf32>, vector<2x8x8xf32> -> vector<2x8x8xf32>
    "tpu.trace_stop"() : () -> ()
    %222 = vector.shape_cast %221 : vector<2x8x8xf32> to vector<16x8xf32>
    %223 = vector.extract_strided_slice %170 {offsets = [8, 0], sizes = [8, 32], strides = [1, 1]} : vector<32x32xf32> to vector<8x32xf32>
    %cst_75 = arith.constant dense<0.000000e+00> : vector<16x32xf32>
    %224 = tpu.matmul %222, %223, %cst_75 {dimension_numbers = #tpu.dot_dimension_numbers<[1], [0], [0], [1], [0, 0, 1, 1], [], []>} : vector<16x8xf32>, vector<8x32xf32>, vector<16x32xf32> -> vector<16x32xf32>
    %225 = arith.addf %203, %224 : vector<16x32xf32>
    %226 = vector.extract_strided_slice %180 {offsets = [0, 16], sizes = [16, 8], strides = [1, 1]} : vector<16x96xf32> to vector<16x8xf32>
    %227 = vector.shape_cast %226 : vector<16x8xf32> to vector<2x8x8xf32>
    %228 = vector.extract_strided_slice %180 {offsets = [0, 48], sizes = [16, 8], strides = [1, 1]} : vector<16x96xf32> to vector<16x8xf32>
    %229 = vector.shape_cast %228 : vector<16x8xf32> to vector<2x8x8xf32>
    %230 = vector.extract_strided_slice %180 {offsets = [0, 80], sizes = [16, 8], strides = [1, 1]} : vector<16x96xf32> to vector<16x8xf32>
    %231 = vector.shape_cast %230 : vector<16x8xf32> to vector<2x8x8xf32>
    "tpu.trace_start"() <{level = 10 : i32, message = "bqd,bkd->bqk"}> : () -> ()
    %cst_76 = arith.constant dense<0.000000e+00> : vector<2x8x8xf32>
    %232 = tpu.matmul %227, %229, %cst_76 {dimension_numbers = #tpu.dot_dimension_numbers<[2], [2], [1], [1], [0, 0, 0, 1, 1, 1], [0], [0]>} : vector<2x8x8xf32>, vector<2x8x8xf32>, vector<2x8x8xf32> -> vector<2x8x8xf32>
    "tpu.trace_stop"() : () -> ()
    %cst_77 = arith.constant dense<0xFF800000> : vector<2x8xf32>
    %233 = vector.multi_reduction <maximumf>, %232, %cst_77 [2] : vector<2x8x8xf32> to vector<2x8xf32>
    %234 = vector.shape_cast %233 : vector<2x8xf32> to vector<2x8x1xf32>
    %235 = vector.broadcast %234 : vector<2x8x1xf32> to vector<2x8x8xf32>
    %236 = arith.subf %232, %235 : vector<2x8x8xf32>
    %237 = math.exp %236 : vector<2x8x8xf32>
    %cst_78 = arith.constant dense<0.000000e+00> : vector<2x8xf32>
    %238 = vector.multi_reduction <add>, %237, %cst_78 [2] : vector<2x8x8xf32> to vector<2x8xf32>
    %239 = vector.shape_cast %238 : vector<2x8xf32> to vector<2x8x1xf32>
    %240 = tpu.reciprocal %239 {approx = true} : vector<2x8x1xf32> -> vector<2x8x1xf32>
    %241 = vector.broadcast %240 : vector<2x8x1xf32> to vector<2x8x8xf32>
    %242 = arith.mulf %237, %241 : vector<2x8x8xf32>
    "tpu.trace_start"() <{level = 10 : i32, message = "bqk,bkd->bqd"}> : () -> ()
    %cst_79 = arith.constant dense<0.000000e+00> : vector<2x8x8xf32>
    %243 = tpu.matmul %242, %231, %cst_79 {dimension_numbers = #tpu.dot_dimension_numbers<[2], [1], [1], [2], [0, 0, 0, 1, 1, 2], [0], [0]>} : vector<2x8x8xf32>, vector<2x8x8xf32>, vector<2x8x8xf32> -> vector<2x8x8xf32>
    "tpu.trace_stop"() : () -> ()
    %244 = vector.shape_cast %243 : vector<2x8x8xf32> to vector<16x8xf32>
    %245 = vector.extract_strided_slice %170 {offsets = [16, 0], sizes = [8, 32], strides = [1, 1]} : vector<32x32xf32> to vector<8x32xf32>
    %cst_80 = arith.constant dense<0.000000e+00> : vector<16x32xf32>
    %246 = tpu.matmul %244, %245, %cst_80 {dimension_numbers = #tpu.dot_dimension_numbers<[1], [0], [0], [1], [0, 0, 1, 1], [], []>} : vector<16x8xf32>, vector<8x32xf32>, vector<16x32xf32> -> vector<16x32xf32>
    %247 = arith.addf %225, %246 : vector<16x32xf32>
    %248 = vector.extract_strided_slice %180 {offsets = [0, 24], sizes = [16, 8], strides = [1, 1]} : vector<16x96xf32> to vector<16x8xf32>
    %249 = vector.shape_cast %248 : vector<16x8xf32> to vector<2x8x8xf32>
    %250 = vector.extract_strided_slice %180 {offsets = [0, 56], sizes = [16, 8], strides = [1, 1]} : vector<16x96xf32> to vector<16x8xf32>
    %251 = vector.shape_cast %250 : vector<16x8xf32> to vector<2x8x8xf32>
    %252 = vector.extract_strided_slice %180 {offsets = [0, 88], sizes = [16, 8], strides = [1, 1]} : vector<16x96xf32> to vector<16x8xf32>
    %253 = vector.shape_cast %252 : vector<16x8xf32> to vector<2x8x8xf32>
    "tpu.trace_start"() <{level = 10 : i32, message = "bqd,bkd->bqk"}> : () -> ()
    %cst_81 = arith.constant dense<0.000000e+00> : vector<2x8x8xf32>
    %254 = tpu.matmul %249, %251, %cst_81 {dimension_numbers = #tpu.dot_dimension_numbers<[2], [2], [1], [1], [0, 0, 0, 1, 1, 1], [0], [0]>} : vector<2x8x8xf32>, vector<2x8x8xf32>, vector<2x8x8xf32> -> vector<2x8x8xf32>
    "tpu.trace_stop"() : () -> ()
    %cst_82 = arith.constant dense<0xFF800000> : vector<2x8xf32>
    %255 = vector.multi_reduction <maximumf>, %254, %cst_82 [2] : vector<2x8x8xf32> to vector<2x8xf32>
    %256 = vector.shape_cast %255 : vector<2x8xf32> to vector<2x8x1xf32>
    %257 = vector.broadcast %256 : vector<2x8x1xf32> to vector<2x8x8xf32>
    %258 = arith.subf %254, %257 : vector<2x8x8xf32>
    %259 = math.exp %258 : vector<2x8x8xf32>
    %cst_83 = arith.constant dense<0.000000e+00> : vector<2x8xf32>
    %260 = vector.multi_reduction <add>, %259, %cst_83 [2] : vector<2x8x8xf32> to vector<2x8xf32>
    %261 = vector.shape_cast %260 : vector<2x8xf32> to vector<2x8x1xf32>
    %262 = tpu.reciprocal %261 {approx = true} : vector<2x8x1xf32> -> vector<2x8x1xf32>
    %263 = vector.broadcast %262 : vector<2x8x1xf32> to vector<2x8x8xf32>
    %264 = arith.mulf %259, %263 : vector<2x8x8xf32>
    "tpu.trace_start"() <{level = 10 : i32, message = "bqk,bkd->bqd"}> : () -> ()
    %cst_84 = arith.constant dense<0.000000e+00> : vector<2x8x8xf32>
    %265 = tpu.matmul %264, %253, %cst_84 {dimension_numbers = #tpu.dot_dimension_numbers<[2], [1], [1], [2], [0, 0, 0, 1, 1, 2], [0], [0]>} : vector<2x8x8xf32>, vector<2x8x8xf32>, vector<2x8x8xf32> -> vector<2x8x8xf32>
    "tpu.trace_stop"() : () -> ()
    %266 = vector.shape_cast %265 : vector<2x8x8xf32> to vector<16x8xf32>
    %267 = vector.extract_strided_slice %170 {offsets = [24, 0], sizes = [8, 32], strides = [1, 1]} : vector<32x32xf32> to vector<8x32xf32>
    %cst_85 = arith.constant dense<0.000000e+00> : vector<16x32xf32>
    %268 = tpu.matmul %266, %267, %cst_85 {dimension_numbers = #tpu.dot_dimension_numbers<[1], [0], [0], [1], [0, 0, 1, 1], [], []>} : vector<16x8xf32>, vector<8x32xf32>, vector<16x32xf32> -> vector<16x32xf32>
    %269 = arith.addf %247, %268 : vector<16x32xf32>
    %270 = vector.extract_strided_slice %176 {offsets = [1, 0], sizes = [1, 32], strides = [1, 1]} : vector<8x96xf32> to vector<1x32xf32>
    %271 = vector.broadcast %270 : vector<1x32xf32> to vector<16x32xf32>
    %272 = arith.addf %269, %271 : vector<16x32xf32>
    %273 = arith.addf %166, %272 : vector<16x32xf32>
    %274 = vector.extract_strided_slice %176 {offsets = [2, 0], sizes = [1, 32], strides = [1, 1]} : vector<8x96xf32> to vector<1x32xf32>
    %275 = vector.extract_strided_slice %176 {offsets = [3, 0], sizes = [1, 32], strides = [1, 1]} : vector<8x96xf32> to vector<1x32xf32>
    %cst_86 = arith.constant dense<0.000000e+00> : vector<16xf32>
    %276 = vector.multi_reduction <add>, %273, %cst_86 [1] : vector<16x32xf32> to vector<16xf32>
    %277 = vector.shape_cast %276 : vector<16xf32> to vector<16x1xf32>
    %cst_87 = arith.constant 3.200000e+01 : f32
    %278 = vector.broadcast %cst_87 : f32 to vector<16x1xf32>
    %279 = arith.divf %277, %278 : vector<16x1xf32>
    %280 = vector.broadcast %279 : vector<16x1xf32> to vector<16x32xf32>
    %281 = arith.subf %273, %280 : vector<16x32xf32>
    %282 = arith.mulf %281, %281 : vector<16x32xf32>
    %cst_88 = arith.constant dense<0.000000e+00> : vector<16xf32>
    %283 = vector.multi_reduction <add>, %282, %cst_88 [1] : vector<16x32xf32> to vector<16xf32>
    %284 = vector.shape_cast %283 : vector<16xf32> to vector<16x1xf32>
    %cst_89 = arith.constant 3.200000e+01 : f32
    %285 = vector.broadcast %cst_89 : f32 to vector<16x1xf32>
    %286 = arith.divf %284, %285 : vector<16x1xf32>
    %287 = vector.broadcast %279 : vector<16x1xf32> to vector<16x32xf32>
    %288 = arith.subf %273, %287 : vector<16x32xf32>
    %cst_90 = arith.constant 9.99999974E-6 : f32
    %289 = vector.broadcast %cst_90 : f32 to vector<16x1xf32>
    %290 = arith.addf %286, %289 : vector<16x1xf32>
    %291 = math.rsqrt %290 : vector<16x1xf32>
    %292 = vector.broadcast %291 : vector<16x1xf32> to vector<16x32xf32>
    %293 = arith.mulf %288, %292 : vector<16x32xf32>
    %294 = vector.broadcast %274 : vector<1x32xf32> to vector<16x32xf32>
    %295 = arith.mulf %293, %294 : vector<16x32xf32>
    %296 = vector.broadcast %275 : vector<1x32xf32> to vector<16x32xf32>
    %297 = arith.addf %295, %296 : vector<16x32xf32>
    %cst_91 = arith.constant dense<0.000000e+00> : vector<16x64xf32>
    %298 = tpu.matmul %297, %172, %cst_91 {dimension_numbers = #tpu.dot_dimension_numbers<[1], [0], [0], [1], [0, 0, 1, 1], [], []>} : vector<16x32xf32>, vector<32x64xf32>, vector<16x64xf32> -> vector<16x64xf32>
    %299 = vector.extract_strided_slice %176 {offsets = [4, 0], sizes = [1, 64], strides = [1, 1]} : vector<8x96xf32> to vector<1x64xf32>
    %300 = vector.broadcast %299 : vector<1x64xf32> to vector<16x64xf32>
    %301 = arith.addf %298, %300 : vector<16x64xf32>
    %cst_92 = arith.constant 0.000000e+00 : f32
    %302 = vector.broadcast %cst_92 : f32 to vector<16x64xf32>
    %303 = arith.maximumf %301, %302 : vector<16x64xf32>
    %cst_93 = arith.constant dense<0.000000e+00> : vector<16x32xf32>
    %304 = tpu.matmul %303, %174, %cst_93 {dimension_numbers = #tpu.dot_dimension_numbers<[1], [0], [0], [1], [0, 0, 1, 1], [], []>} : vector<16x64xf32>, vector<64x32xf32>, vector<16x32xf32> -> vector<16x32xf32>
    %305 = vector.extract_strided_slice %176 {offsets = [5, 0], sizes = [1, 32], strides = [1, 1]} : vector<8x96xf32> to vector<1x32xf32>
    %306 = vector.broadcast %305 : vector<1x32xf32> to vector<16x32xf32>
    %307 = arith.addf %304, %306 : vector<16x32xf32>
    %308 = arith.addf %297, %307 : vector<16x32xf32>
    %309 = vector.extract_strided_slice %176 {offsets = [6, 0], sizes = [1, 32], strides = [1, 1]} : vector<8x96xf32> to vector<1x32xf32>
    %310 = vector.extract_strided_slice %176 {offsets = [7, 0], sizes = [1, 32], strides = [1, 1]} : vector<8x96xf32> to vector<1x32xf32>
    %cst_94 = arith.constant dense<0.000000e+00> : vector<16xf32>
    %311 = vector.multi_reduction <add>, %308, %cst_94 [1] : vector<16x32xf32> to vector<16xf32>
    %312 = vector.shape_cast %311 : vector<16xf32> to vector<16x1xf32>
    %cst_95 = arith.constant 3.200000e+01 : f32
    %313 = vector.broadcast %cst_95 : f32 to vector<16x1xf32>
    %314 = arith.divf %312, %313 : vector<16x1xf32>
    %315 = vector.broadcast %314 : vector<16x1xf32> to vector<16x32xf32>
    %316 = arith.subf %308, %315 : vector<16x32xf32>
    %317 = arith.mulf %316, %316 : vector<16x32xf32>
    %cst_96 = arith.constant dense<0.000000e+00> : vector<16xf32>
    %318 = vector.multi_reduction <add>, %317, %cst_96 [1] : vector<16x32xf32> to vector<16xf32>
    %319 = vector.shape_cast %318 : vector<16xf32> to vector<16x1xf32>
    %cst_97 = arith.constant 3.200000e+01 : f32
    %320 = vector.broadcast %cst_97 : f32 to vector<16x1xf32>
    %321 = arith.divf %319, %320 : vector<16x1xf32>
    %322 = vector.broadcast %314 : vector<16x1xf32> to vector<16x32xf32>
    %323 = arith.subf %308, %322 : vector<16x32xf32>
    %cst_98 = arith.constant 9.99999974E-6 : f32
    %324 = vector.broadcast %cst_98 : f32 to vector<16x1xf32>
    %325 = arith.addf %321, %324 : vector<16x1xf32>
    %326 = math.rsqrt %325 : vector<16x1xf32>
    %327 = vector.broadcast %326 : vector<16x1xf32> to vector<16x32xf32>
    %328 = arith.mulf %323, %327 : vector<16x32xf32>
    %329 = vector.broadcast %309 : vector<1x32xf32> to vector<16x32xf32>
    %330 = arith.mulf %328, %329 : vector<16x32xf32>
    %331 = vector.broadcast %310 : vector<1x32xf32> to vector<16x32xf32>
    %332 = arith.addf %330, %331 : vector<16x32xf32>
    %333 = vector.shape_cast %332 : vector<16x32xf32> to vector<2x8x32xf32>
    %cst_99 = arith.constant dense<0.000000e+00> : vector<2x32xf32>
    %334 = vector.multi_reduction <add>, %333, %cst_99 [1] : vector<2x8x32xf32> to vector<2x32xf32>
    %cst_100 = arith.constant 1.250000e-01 : f32
    %335 = vector.broadcast %cst_100 : f32 to vector<2x32xf32>
    %336 = arith.mulf %334, %335 : vector<2x32xf32>
    %c0_101 = arith.constant 0 : index
    %c0_102 = arith.constant 0 : index
    %337 = vector.load %arg6[%c0_101, %c0_102] : memref<32x8xf32, #tpu.memory_space<vmem>>, vector<32x8xf32>
    %cst_103 = arith.constant dense<0.000000e+00> : vector<2x8xf32>
    %338 = tpu.matmul %336, %337, %cst_103 {dimension_numbers = #tpu.dot_dimension_numbers<[1], [0], [0], [1], [0, 0, 1, 1], [], []>} : vector<2x32xf32>, vector<32x8xf32>, vector<2x8xf32> -> vector<2x8xf32>
    %c0_104 = arith.constant 0 : index
    %c0_105 = arith.constant 0 : index
    %339 = vector.load %arg7[%c0_104, %c0_105] : memref<1x8xf32, #tpu.memory_space<vmem>>, vector<1x8xf32>
    %340 = vector.broadcast %339 : vector<1x8xf32> to vector<2x8xf32>
    %341 = arith.addf %338, %340 : vector<2x8xf32>
    %cst_106 = arith.constant dense<0xFF800000> : vector<2xf32>
    %342 = vector.multi_reduction <maximumf>, %341, %cst_106 [1] : vector<2x8xf32> to vector<2xf32>
    %343 = vector.shape_cast %342 : vector<2xf32> to vector<2x1xf32>
    %344 = vector.broadcast %343 : vector<2x1xf32> to vector<2x8xf32>
    %345 = arith.subf %341, %344 : vector<2x8xf32>
    %346 = math.exp %345 : vector<2x8xf32>
    %cst_107 = arith.constant dense<0.000000e+00> : vector<2xf32>
    %347 = vector.multi_reduction <add>, %346, %cst_107 [1] : vector<2x8xf32> to vector<2xf32>
    %348 = vector.shape_cast %347 : vector<2xf32> to vector<2x1xf32>
    %349 = vector.broadcast %348 : vector<2x1xf32> to vector<2x8xf32>
    %350 = arith.divf %346, %349 : vector<2x8xf32>
    %c0_108 = arith.constant 0 : index
    %c0_109 = arith.constant 0 : index
    %351 = vector.load %arg8[%c0_108, %c0_109] : memref<2x8xf32, #tpu.memory_space<vmem>>, vector<2x8xf32>
    tpu.vector_store %arg8[%c0_108, %c0_109], %350 {strides = array<i32>} : memref<2x8xf32, #tpu.memory_space<vmem>>, vector<2x8xf32>,
    return
  }
}

</mosaic_0001>

<bundles_post_ra>
// kernel: forward.1
= control target key start
LH: loop header
LB: loop body
LE: loop exit
PB: predicated region body
PF: predicated region fallthrough
CT: control target
= control target key end

     0   :  { %vm57_vm0 = vcmask 261120   ;;  %s5562_s0 = inlined_call_operand.vmem [shape: f32[16,32], index: 0, kind: input, shape index: {}]   ;;  %s5563_s1 = inlined_call_operand.vmem [shape: f32[2,32,96], index: 1, kind: input, shape index: {}]   ;;  %s5564_s2 = inlined_call_operand.vmem [shape: f32[2,32,32], index: 2, kind: input, shape index: {}]   ;;  %s5565_s3 = inlined_call_operand.vmem [shape: f32[2,32,64], index: 3, kind: input, shape index: {}]   ;;  %s5566_s4 = inlined_call_operand.vmem [shape: f32[2,64,32], index: 4, kind: input, shape index: {}]   ;;  %s5567_s5 = inlined_call_operand.vmem [shape: f32[2,8,96], index: 5, kind: input, shape index: {}]   ;;  %s5568_s6 = inlined_call_operand.vmem [shape: f32[32,8], index: 6, kind: input, shape index: {}]   ;;  %s5569_s7 = inlined_call_operand.vmem [shape: f32[1,8], index: 7, kind: input, shape index: {}]   ;;  %s5570_s8 = inlined_call_operand.hbm [shape: f32[2,8], index: 8, kind: output, shape index: {}]  }
   0x1   :  { %v32_v0 = vld [vmem:[%s5563_s1] sm:$0xff]  ;;  %v33_v1 = vld [vmem:[%s5563_s1 + $0x8] sm:$0xff]  ;;  %v34_v2 = vld [vmem:[%s5563_s1 + $0x10] sm:$0xff] }
   0x2   :  { %v4720_v3 = vpack.c.bf16 %v33_v1, %v32_v0  ;;  %v35_v4 = vld [vmem:[%s5563_s1 + $0x18] sm:$0xff]  ;;  %v5000_v5 = vld [vmem:[%s5562_s0] sm:$0xff] }
   0x3   :  { %v4724_v6 = vpack.c.bf16 %v35_v4, %v34_v2  ;;  %4435 = vmatprep.mubr.msk.f32.mxu0 %vm57_vm0, %v5000_v5 }
   0x4   :  { %13 = vsyncpa [#allocation3], 0  ;;  %4721 = vmatprep.subr.bf16.mxu0 %v4720_v3  ;;  %v5007_v7 = vld [vmem:[%s5562_s0 + $0x8] sm:$0xff]  ;;  %v4925_v8 = vmov 0.0   ;;  %v53_v9 = vlaneseq  ;;  %vm4926_vm1 = vmmov 0   ;;  %v5023_v12 = vld [vmem:[%s5567_s5] sm:$0xff] }
   0x5   :  { %4723 = vmatpush3.bf16.msra.mxu0 %v4720_v3  ;;  %4438 = vmatprep.subr.mxu1 %v4925_v8  ;;  %s4927_s18 = smov 96   ;;  %vm142_vm2 = vcmask 64512   ;;  %s4928_s19 = smov 64   ;;  %vm1924_vm3 = vcmask 523264   ;;  %vm4090_vm4 = vcmask 1041409   ;;  %vm4164_vm5 = vcmask 58368  }
   0x6   :  { %4725 = vmatprep.subr.bf16.mxu0 %v4724_v6  ;;  %v5013_v10 = vshrl.u32 %v53_v9, 7  ;;  %4440 = vmatprep.mubr.msk.f32.mxu1 %vm4926_vm1, %v4925_v8  ;;  %s4929_s20 = smov 88   ;;  %s4930_s21 = smov 120  }
   0x7   :  { %s4931_s22 = smov 56   ;;  %s4932_s23 = smov 112  }
   0x8   :  { %v55_v11 = vsub.s32 0, %v5013_v10  ;;  %s4933_s24 = smov 80   ;;  %s4934_s25 = smov 48  }
   0x9   :  { %4727 = vmatpush3.bf16.msra.mxu0 %v4724_v6  ;;  %s4935_s26 = smov 72   ;;  %s4936_s27 = smov 104  }
   0xa   :  { %4458 = vmatprep.subr.mxu0 %v4925_v8  ;;  %v56_v13 = vrot.slane %v5023_v12, %v55_v11  ;;  %s4937_s12 = smov 40   ;;  %s4939_s11 = smov [#allocation2]  }
   0xb   :  { %s4183_s13 = sshll.u32 %s4939_s11, 4  ;;  %s4184_s13 = int_to_ptr.vmem [resolvable:$true] %s4183_s13 }
   0xc   :  { %4436 = vmatmul.mubr.msk.f32.vlgmr.msra.gmra.mrb[0].mxu0 %vm57_vm0, %v5007_v7  ;;  %p4906_p1 = scmp.lt.s32.totalorder %s4184_s13, %s4184_s13 }
   0xd   :  { %4460 = vmatprep.mubr.msk.f32.mxu0 %vm4926_vm1, %v4925_v8 }
  0xdf   :  { %v4437_v14 = vpop.f32.mrb[0].mxu0 }
  0xe0   :  { %v130_v15 = vpop.f32.mrb[1].mxu0  ;;  %v5032_v17 = vadd.f32 %v4437_v14, %v56_v13 }
  0xe1   :  { %v5028_v16 = vadd.f32 %v130_v15, %v56_v13 }
  0xe3   :  { %140 = vrot.lane.b32.xlu0 %v5028_v16, %s4927_s18 }
  0xe7   :  { %218 = vrot.lane.b32.xlu0 %v5032_v17, %s4927_s18 }
 0x155   :  { %v141_v18 = vpop.permute.xlu0 %140 }
 0x156   :  { %4439 = vmatpush3.xpose.msk.msra.mxu1 %vm142_vm2, %v141_v18 }
 0x157   :  { %4443 = vmatprep.subr.mxu1 %v4925_v8 }
 0x159   :  { %4441 = vmatmul.mubr.msk.f32.vlgmr.msra.gmra.mrb[0].mxu1 %vm142_vm2, %v5028_v16  ;;  %v219_v19 = vpop.permute.xlu0 %218 }
 0x15a   :  { %4444 = vmatpush3.xpose.msk.msra.mxu1 %vm142_vm2, %v219_v19  ;;  %4445 = vmatprep.mubr.msk.f32.mxu1 %vm4926_vm1, %v4925_v8 }
 0x15b   :  { %4448 = vmatprep.subr.mxu1 %v4925_v8 }
 0x15d   :  { %4446 = vmatmul.mubr.msk.f32.vlgmr.msra.gmra.mrb[2].mxu1 %vm142_vm2, %v5032_v17 }
 0x15e   :  { %4450 = vmatprep.mubr.msk.f32.mxu1 %vm4926_vm1, %v4925_v8 }
 0x22c   :  { %v213_v20 = vpop.f32.mrb[0].mxu1 }
 0x22d   :  { %v4442_v21 = vpop.f32.mrb[1].mxu1  ;;  %v294_v22 = vsel %vm142_vm2, %v213_v20, -inf }
 0x22e   :  { %295 = vmax.xlane.f32.xlu1 %v294_v22 }
 0x230   :  { %v290_v23 = vpop.f32.mrb[2].mxu1 }
 0x231   :  { %v4447_v24 = vpop.f32.mrb[3].mxu1  ;;  %v297_v25 = vsel %vm142_vm2, %v290_v23, -inf }
 0x232   :  { %298 = vmax.xlane.f32.xlu1 %v297_v25  ;;  %v37_v25 = vld [vmem:[%s5564_s2 + $0x8] sm:$0xff] }
 0x243   :  { %316 = vrot.lane.b32.xlu1 %v5028_v16, %s4928_s19 }
 0x247   :  { %392 = vrot.lane.b32.xlu1 %v5032_v17, %s4928_s19 }
 0x24b   :  { %548 = vrot.lane.b32.xlu1 %v5032_v17, %s4929_s20 }
 0x2bb   :  { %v296_v26 = vpop.xlane.xlu1 %295 }
 0x2bc   :  { %v300_v27 = vsub.f32 %v213_v20, %v296_v26  ;;  %v36_v26 = vld [vmem:[%s5564_s2] sm:$0xff] }
 0x2be   :  { %v302_v28 = vmul.f32 1.442695, %v300_v27 }
 0x2bf   :  { %v299_v29 = vpop.xlane.xlu1 %298 }
 0x2c0   :  { %4817 = vpow2.f32 %v302_v28  ;;  %v301_v30 = vsub.f32 %v290_v23, %v299_v29 }
 0x2c2   :  { %v304_v31 = vmul.f32 1.442695, %v301_v30 }
 0x2c3   :  { %v317_v32 = vpop.permute.xlu1 %316 }
 0x2c4   :  { %4819 = vpow2.f32 %v304_v31  ;;  %4449 = vmatpush3.msra.mxu1 %v317_v32 }
 0x2c5   :  { %4453 = vmatprep.subr.mxu1 %v4925_v8 }
 0x2c7   :  { %v393_v37 = vpop.permute.xlu1 %392 }
 0x2ca   :  { %v4818_v33 = vpop.eup %4817 }
 0x2cb   :  { %v306_v34 = vsel %vm142_vm2, %v4818_v33, 0.0  ;;  %v549_v38 = vpop.permute.xlu1 %548 }
 0x2cc   :  { %307 = vadd.xlane.f32.xlu0 %v306_v34 }
 0x2ce   :  { %v4820_v35 = vpop.eup %4819 }
 0x2cf   :  { %v309_v36 = vsel %vm142_vm2, %v4820_v35, 0.0 }
 0x2d0   :  { %310 = vadd.xlane.f32.xlu1 %v309_v36 }
 0x2e1   :  { %546 = vrot.lane.b32.xlu1 %v5032_v17, %s4930_s21 }
 0x2e2   :  { %470 = vrot.lane.b32.xlu0 %v5028_v16, %s4929_s20 }
 0x2e5   :  { %468 = vrot.lane.b32.xlu1 %v5028_v16, %s4930_s21 }
 0x359   :  { %v308_v39 = vpop.xlane.xlu0 %307 }
 0x35a   :  { %4821 = vrcp.f32 %v308_v39 }
 0x35d   :  { %v311_v40 = vpop.xlane.xlu1 %310  ;;  %v471_v41 = vpop.permute.xlu0 %470 }
 0x35e   :  { %4823 = vrcp.f32 %v311_v40  ;;  %4459 = vmatpush3.xpose.msk.msra.mxu0 %vm142_vm2, %v471_v41 }
 0x35f   :  { %4468 = vmatprep.subr.mxu0 %v4925_v8 }
 0x361   :  { %v547_v42 = vpop.permute.xlu1 %546 }
 0x364   :  { %v4822_v43 = vpop.eup %4821 }
 0x365   :  { %v314_v44 = vmul.f32 %v4822_v43, %v4818_v33  ;;  %v469_v45 = vpop.permute.xlu1 %468 }
 0x366   :  { %4461 = vmatmul.mubr.msk.f32.vlgmr.msra.gmra.mrb[2].mxu0 %vm142_vm2, %v469_v45 }
 0x367   :  { %4451 = vmatmul.mubr.msk.f32.vlgmr.msra.gmra.mrb[4].mxu1 %vm142_vm2, %v314_v44  ;;  %4470 = vmatprep.mubr.msk.f32.mxu0 %vm4926_vm1, %v4925_v8 }
 0x368   :  { %v4824_v46 = vpop.eup %4823  ;;  %4454 = vmatpush3.msra.mxu1 %v393_v37  ;;  %4455 = vmatprep.mubr.msk.f32.mxu1 %vm4926_vm1, %v4925_v8 }
 0x369   :  { %v315_v47 = vmul.f32 %v4824_v46, %v4820_v35  ;;  %4463 = vmatprep.subr.mxu1 %v4925_v8 }
 0x36b   :  { %4456 = vmatmul.mubr.msk.f32.vlgmr.msra.gmra.mrb[6].mxu1 %vm142_vm2, %v315_v47 }
 0x36c   :  { %4465 = vmatprep.mubr.msk.f32.mxu1 %vm4926_vm1, %v4925_v8 }
 0x36f   :  { %4464 = vmatpush3.xpose.msk.msra.mxu1 %vm142_vm2, %v549_v38 }
 0x370   :  { %4473 = vmatprep.subr.mxu1 %v4925_v8 }
 0x372   :  { %4466 = vmatmul.mubr.msk.f32.vlgmr.msra.gmra.mrb[8].mxu1 %vm142_vm2, %v547_v42 }
 0x373   :  { %4475 = vmatprep.mubr.msk.f32.mxu1 %vm4926_vm1, %v4925_v8 }
 0x439   :  { %v542_v48 = vpop.f32.mrb[2].mxu0 }
 0x43a   :  { %v5082_v49 = vpop.f32.mrb[4].mxu1  ;;  %v4462_v50 = vpop.f32.mrb[3].mxu0  ;;  %v624_v57 = vsel %vm142_vm2, %v542_v48, -inf }
 0x43b   :  { %v4452_v51 = vpop.f32.mrb[5].mxu1 }
 0x43e   :  { %v5084_v52 = vpop.f32.mrb[6].mxu1 }
 0x43f   :  { %v4457_v53 = vpop.f32.mrb[7].mxu1 }
 0x445   :  { %v620_v54 = vpop.f32.mrb[8].mxu1 }
 0x446   :  { %v4467_v55 = vpop.f32.mrb[9].mxu1  ;;  %v627_v56 = vsel %vm142_vm2, %v620_v54, -inf }
 0x447   :  { %628 = vmax.xlane.f32.xlu1 %v627_v56 }
 0x458   :  { %722 = vrot.lane.b32.xlu1 %v5032_v17, %s4931_s22 }
 0x45c   :  { %960 = vrot.lane.b32.xlu1 %v5028_v16, %s4932_s23 }
 0x460   :  { %1040 = vrot.lane.b32.xlu1 %v5032_v17, %s4933_s24 }
 0x464   :  { %1038 = vrot.lane.b32.xlu1 %v5032_v17, %s4932_s23 }
 0x488   :  { %625 = vmax.xlane.f32.xlu1 %v624_v57 }
 0x4d4   :  { %v629_v58 = vpop.xlane.xlu1 %628 }
 0x4d5   :  { %v631_v59 = vsub.f32 %v620_v54, %v629_v58 }
 0x4d7   :  { %v634_v60 = vmul.f32 1.442695, %v631_v59 }
 0x4d8   :  { %v723_v61 = vpop.permute.xlu1 %722 }
 0x4d9   :  { %4825 = vpow2.f32 %v634_v60  ;;  %4474 = vmatpush3.msra.mxu1 %v723_v61 }
 0x4da   :  { %4488 = vmatprep.subr.mxu1 %v4925_v8 }
 0x4dc   :  { %v961_v0 = vpop.permute.xlu1 %960 }
 0x4e0   :  { %v1041_v1 = vpop.permute.xlu1 %1040 }
 0x4e3   :  { %v4826_v62 = vpop.eup %4825 }
 0x4e4   :  { %v639_v63 = vsel %vm142_vm2, %v4826_v62, 0.0  ;;  %v1039_v2 = vpop.permute.xlu1 %1038 }
 0x4e5   :  { %640 = vadd.xlane.f32.xlu0 %v639_v63 }
 0x4fb   :  { %962 = vrot.lane.b32.xlu0 %v5028_v16, %s4933_s24 }
 0x515   :  { %v626_v3 = vpop.xlane.xlu1 %625 }
 0x516   :  { %v630_v4 = vsub.f32 %v542_v48, %v626_v3 }
 0x518   :  { %v632_v6 = vmul.f32 1.442695, %v630_v4 }
 0x51a   :  { %4827 = vpow2.f32 %v632_v6 }
 0x524   :  { %v4828_v9 = vpop.eup %4827 }
 0x525   :  { %v636_v13 = vsel %vm142_vm2, %v4828_v9, 0.0 }
 0x526   :  { %637 = vadd.xlane.f32.xlu0 %v636_v13 }
 0x53c   :  { %646 = vrot.lane.b32.xlu0 %v5028_v16, %s4931_s22 }
 0x540   :  { %1214 = vrot.lane.b32.xlu0 %v5032_v17, %s4934_s25 }
 0x544   :  { %1375 = vrot.lane.b32.xlu0 %v5028_v16, %s4935_s26 }
 0x548   :  { %1453 = vrot.lane.b32.xlu0 %v5032_v17, %s4935_s26 }
 0x54c   :  { %1373 = vrot.lane.b32.xlu0 %v5028_v16, %s4936_s27 }
 0x572   :  { %v641_v14 = vpop.xlane.xlu0 %640 }
 0x573   :  { %4829 = vrcp.f32 %v641_v14 }
 0x576   :  { %v963_v19 = vpop.permute.xlu0 %962 }
 0x57d   :  { %v4830_v15 = vpop.eup %4829 }
 0x57e   :  { %v645_v18 = vmul.f32 %v4830_v15, %v4826_v62 }
 0x580   :  { %4476 = vmatmul.mubr.msk.f32.vlgmr.msra.gmra.mrb[10].mxu1 %vm142_vm2, %v645_v18 }
 0x581   :  { %4489 = vmatpush3.xpose.msk.msra.mxu1 %vm142_vm2, %v963_v19  ;;  %4490 = vmatprep.mubr.msk.f32.mxu1 %vm4926_vm1, %v4925_v8 }
 0x582   :  { %4493 = vmatprep.subr.mxu1 %v4925_v8 }
 0x584   :  { %4491 = vmatmul.mubr.msk.f32.vlgmr.msra.gmra.mrb[12].mxu1 %vm142_vm2, %v961_v0 }
 0x585   :  { %4494 = vmatpush3.xpose.msk.msra.mxu1 %vm142_vm2, %v1041_v1  ;;  %4495 = vmatprep.mubr.msk.f32.mxu1 %vm4926_vm1, %v4925_v8 }
 0x586   :  { %4503 = vmatprep.subr.mxu1 %v4925_v8 }
 0x588   :  { %4496 = vmatmul.mubr.msk.f32.vlgmr.msra.gmra.mrb[14].mxu1 %vm142_vm2, %v1039_v2 }
 0x589   :  { %4505 = vmatprep.mubr.msk.f32.mxu1 %vm4926_vm1, %v4925_v8 }
 0x5b3   :  { %v638_v20 = vpop.xlane.xlu0 %637 }
 0x5b4   :  { %4831 = vrcp.f32 %v638_v20 }
 0x5b7   :  { %v647_v21 = vpop.permute.xlu0 %646 }
 0x5b8   :  { %4469 = vmatpush3.msra.mxu0 %v647_v21 }
 0x5b9   :  { %4478 = vmatprep.subr.mxu0 %v37_v25 }
 0x5bb   :  { %v1215_v22 = vpop.permute.xlu0 %1214 }
 0x5bc   :  { %4504 = vmatpush3.msra.mxu1 %v1215_v22 }
 0x5bd   :  { %4513 = vmatprep.subr.mxu1 %v4925_v8 }
 0x5be   :  { %v4832_v23 = vpop.eup %4831 }
 0x5bf   :  { %v644_v24 = vmul.f32 %v4832_v23, %v4828_v9  ;;  %v1376_v51 = vpop.permute.xlu0 %1375 }
 0x5c1   :  { %4471 = vmatmul.mubr.msk.f32.vlgmr.msra.gmra.mrb[4].mxu0 %vm142_vm2, %v644_v24 }
 0x5c2   :  { %4479 = vmatpush3.msra.mxu0 %v37_v25 }
 0x5c3   :  { %4483 = vmatprep.subr.mxu0 %v36_v26  ;;  %v1454_v55 = vpop.permute.xlu0 %1453 }
 0x5c7   :  { %v1374_v57 = vpop.permute.xlu0 %1373 }
 0x653   :  { %v794_v27 = vpop.f32.mrb[10].mxu1 }
 0x654   :  { %v4477_v28 = vpop.f32.mrb[11].mxu1 }
 0x657   :  { %v1034_v29 = vpop.f32.mrb[12].mxu1 }
 0x658   :  { %v4492_v30 = vpop.f32.mrb[13].mxu1  ;;  %v1116_v31 = vsel %vm142_vm2, %v1034_v29, -inf }
 0x659   :  { %1117 = vmax.xlane.f32.xlu1 %v1116_v31 }
 0x65b   :  { %v1112_v32 = vpop.f32.mrb[14].mxu1 }
 0x65c   :  { %v4497_v33 = vpop.f32.mrb[15].mxu1  ;;  %v1119_v34 = vsel %vm142_vm2, %v1112_v32, -inf }
 0x65d   :  { %1120 = vmax.xlane.f32.xlu1 %v1119_v34  ;;  %v1788_v34 = vsub.s32 1, %v5013_v10 }
 0x694   :  { %v718_v35 = vpop.f32.mrb[4].mxu0 }
 0x695   :  { %v4472_v36 = vpop.f32.mrb[5].mxu0  ;;  %4480 = vmatprep.mubr.msk.f32.mxu0 %vm142_vm2, %v718_v35  ;;  %v1789_v35 = vrot.slane %v5023_v12, %v1788_v34 }
 0x696   :  { %4481 = vmatmul.mubr.msk.f32.vlgmr.msra.gmra.mrb[6].mxu0 %vm142_vm2, %v794_v27  ;;  %v39_v27 = vld [vmem:[%s5564_s2 + $0x18] sm:$0xff] }
 0x697   :  { %4485 = vmatprep.mubr.msk.f32.mxu0 %vm142_vm2, %v5082_v49  ;;  %4484 = vmatpush3.msra.mxu0 %v36_v26  ;;  %v38_v49 = vld [vmem:[%s5564_s2 + $0x10] sm:$0xff] }
 0x698   :  { %4498 = vmatprep.subr.mxu0 %v4925_v8 }
 0x69e   :  { %4486 = vmatmul.mubr.msk.f32.vlgmr.msra.gmra.mrb[6].mxu0 %vm142_vm2, %v5084_v52 }
 0x69f   :  { %4500 = vmatprep.mubr.msk.f32.mxu0 %vm4926_vm1, %v4925_v8 }
 0x6e6   :  { %v1118_v37 = vpop.xlane.xlu1 %1117 }
 0x6e7   :  { %v1122_v38 = vsub.f32 %v1034_v29, %v1118_v37 }
 0x6e9   :  { %v1124_v39 = vmul.f32 1.442695, %v1122_v38 }
 0x6ea   :  { %v1121_v40 = vpop.xlane.xlu1 %1120 }
 0x6eb   :  { %4833 = vpow2.f32 %v1124_v39  ;;  %v1123_v41 = vsub.f32 %v1112_v32, %v1121_v40 }
 0x6ed   :  { %v1126_v42 = vmul.f32 1.442695, %v1123_v41 }
 0x6ef   :  { %4835 = vpow2.f32 %v1126_v42 }
 0x6f5   :  { %v4834_v43 = vpop.eup %4833 }
 0x6f6   :  { %v1128_v44 = vsel %vm142_vm2, %v4834_v43, 0.0 }
 0x6f7   :  { %1129 = vadd.xlane.f32.xlu1 %v1128_v44 }
 0x6f9   :  { %v4836_v45 = vpop.eup %4835 }
 0x6fa   :  { %v1131_v46 = vsel %vm142_vm2, %v4836_v45, 0.0 }
 0x6fb   :  { %1132 = vadd.xlane.f32.xlu1 %v1131_v46 }
 0x70c   :  { %1138 = vrot.lane.b32.xlu1 %v5028_v16, %s4934_s25 }
 0x710   :  { %1451 = vrot.lane.b32.xlu1 %v5032_v17, %s4936_s27 }
 0x784   :  { %v1130_v47 = vpop.xlane.xlu1 %1129 }
 0x785   :  { %4837 = vrcp.f32 %v1130_v47 }
 0x788   :  { %v1133_v48 = vpop.xlane.xlu1 %1132 }
 0x789   :  { %4839 = vrcp.f32 %v1133_v48 }
 0x78c   :  { %v1139_v50 = vpop.permute.xlu1 %1138 }
 0x78d   :  { %4499 = vmatpush3.msra.mxu0 %v1139_v50 }
 0x78e   :  { %4508 = vmatprep.subr.mxu0 %v38_v49 }
 0x78f   :  { %v4838_v52 = vpop.eup %4837 }
 0x790   :  { %v1136_v53 = vmul.f32 %v4838_v52, %v4834_v43  ;;  %v1452_v62 = vpop.permute.xlu1 %1451 }
 0x792   :  { %4501 = vmatmul.mubr.msk.f32.vlgmr.msra.gmra.mrb[8].mxu0 %vm142_vm2, %v1136_v53  ;;  %v41_v53 = vld [vmem:[%s5565_s3 + $0x8] sm:$0xff] }
 0x793   :  { %v4840_v54 = vpop.eup %4839  ;;  %4509 = vmatpush3.msra.mxu0 %v38_v49 }
 0x794   :  { %v1137_v56 = vmul.f32 %v4840_v54, %v4836_v45  ;;  %4518 = vmatprep.subr.mxu0 %v4925_v8 }
 0x796   :  { %4506 = vmatmul.mubr.msk.f32.vlgmr.msra.gmra.mrb[16].mxu1 %vm142_vm2, %v1137_v56  ;;  %v43_v56 = vld [vmem:[%s5565_s3 + $0x18] sm:$0xff] }
 0x797   :  { %4514 = vmatpush3.xpose.msk.msra.mxu1 %vm142_vm2, %v1376_v51  ;;  %4515 = vmatprep.mubr.msk.f32.mxu1 %vm4926_vm1, %v4925_v8 }
 0x798   :  { %4523 = vmatprep.subr.mxu1 %v4925_v8 }
 0x79a   :  { %4516 = vmatmul.mubr.msk.f32.vlgmr.msra.gmra.mrb[18].mxu1 %vm142_vm2, %v1374_v57 }
 0x79b   :  { %4525 = vmatprep.mubr.msk.f32.mxu1 %vm4926_vm1, %v4925_v8 }
 0x865   :  { %v1210_v58 = vpop.f32.mrb[8].mxu0 }
 0x866   :  { %v4502_v59 = vpop.f32.mrb[9].mxu0  ;;  %4510 = vmatprep.mubr.msk.f32.mxu0 %vm142_vm2, %v1210_v58  ;;  %v44_v58 = vld [vmem:[%s5566_s4] sm:$0xff] }
 0x867   :  { %v45_v59 = vld [vmem:[%s5566_s4 + $0x8] sm:$0xff] }
 0x869   :  { %v1286_v60 = vpop.f32.mrb[16].mxu1 }
 0x86a   :  { %v4507_v61 = vpop.f32.mrb[17].mxu1  ;;  %4511 = vmatmul.mubr.msk.f32.vlgmr.msra.gmra.mrb[6].mxu0 %vm142_vm2, %v1286_v60  ;;  %v46_v60 = vld [vmem:[%s5566_s4 + $0x10] sm:$0xff] }
 0x86b   :  { %4519 = vmatpush3.xpose.msk.msra.mxu0 %vm142_vm2, %v1454_v55  ;;  %4520 = vmatprep.mubr.msk.f32.mxu0 %vm4926_vm1, %v4925_v8  ;;  %v42_v55 = vld [vmem:[%s5565_s3 + $0x10] sm:$0xff]  ;;  %v4736_v61 = vpack.c.bf16 %v45_v59, %v44_v58  ;;  %v4230_v58 = vld [vmem:[%s5563_s1 + $0x28] sm:$0xff] }
 0x86c   :  { %4528 = vmatprep.subr.mxu0 %v4925_v8  ;;  %v4732_v57 = vpack.c.bf16 %v43_v56, %v42_v55 }
 0x86d   :  { %v1447_v63 = vpop.f32.mrb[18].mxu1 }
 0x86e   :  { %v4517_v0 = vpop.f32.mrb[19].mxu1  ;;  %4521 = vmatmul.mubr.msk.f32.vlgmr.msra.gmra.mrb[10].mxu0 %vm142_vm2, %v1452_v62  ;;  %v1529_v1 = vsel %vm142_vm2, %v1447_v63, -inf  ;;  %v47_v62 = vld [vmem:[%s5566_s4 + $0x18] sm:$0xff] }
 0x86f   :  { %1530 = vmax.xlane.f32.xlu0 %v1529_v1  ;;  %4530 = vmatprep.mubr.msk.f32.mxu0 %vm4926_vm1, %v4925_v8  ;;  %v48_v0 = vld [vmem:[%s5566_s4 + $0x20] sm:$0xff]  ;;  %v49_v1 = vld [vmem:[%s5566_s4 + $0x28] sm:$0xff] }
 0x8fc   :  { %v1531_v2 = vpop.xlane.xlu0 %1530 }
 0x8fd   :  { %v1535_v3 = vsub.f32 %v1447_v63, %v1531_v2  ;;  %v4740_v63 = vpack.c.bf16 %v47_v62, %v46_v60  ;;  %v4744_v2 = vpack.c.bf16 %v49_v1, %v48_v0  ;;  %v4231_v60 = vld [vmem:[%s5563_s1 + $0x30] sm:$0xff] }
 0x8ff   :  { %v1537_v4 = vmul.f32 1.442695, %v1535_v3 }
 0x901   :  { %4841 = vpow2.f32 %v1537_v4 }
 0x90b   :  { %v4842_v6 = vpop.eup %4841 }
 0x90c   :  { %v1541_v9 = vsel %vm142_vm2, %v4842_v6, 0.0 }
 0x90d   :  { %1542 = vadd.xlane.f32.xlu0 %v1541_v9 }
 0x941   :  { %v1525_v13 = vpop.f32.mrb[10].mxu0 }
 0x942   :  { %v4522_v14 = vpop.f32.mrb[11].mxu0  ;;  %v1532_v15 = vsel %vm142_vm2, %v1525_v13, -inf }
 0x943   :  { %1533 = vmax.xlane.f32.xlu1 %v1532_v15  ;;  %v1823_v15 = vsub.s32 2, %v5013_v10 }
 0x954   :  { %1551 = vrot.lane.b32.xlu1 %v5028_v16, %s4937_s12 }
 0x99a   :  { %v1543_v18 = vpop.xlane.xlu0 %1542 }
 0x99b   :  { %4843 = vrcp.f32 %v1543_v18  ;;  %v1829_v18 = vsub.s32 3, %v5013_v10 }
 0x9a5   :  { %v4844_v20 = vpop.eup %4843 }
 0x9a6   :  { %v1549_v23 = vmul.f32 %v4844_v20, %v4842_v6 }
 0x9d0   :  { %v1534_v19 = vpop.xlane.xlu1 %1533 }
 0x9d1   :  { %v1536_v21 = vsub.f32 %v1525_v13, %v1534_v19  ;;  %v1824_v19 = vrot.slane %v5023_v12, %v1823_v15 }
 0x9d3   :  { %v1539_v22 = vmul.f32 1.442695, %v1536_v21 }
 0x9d4   :  { %v1552_v24 = vpop.permute.xlu1 %1551 }
 0x9d5   :  { %4845 = vpow2.f32 %v1539_v22  ;;  %4524 = vmatpush3.msra.mxu1 %v1552_v24  ;;  %v1830_v24 = vrot.slane %v5023_v12, %v1829_v18 }
 0x9d6   :  { %4526 = vmatmul.mubr.msk.f32.vlgmr.msra.gmra.mrb[20].mxu1 %vm142_vm2, %v1549_v23 }
 0x9df   :  { %v4846_v25 = vpop.eup %4845 }
 0x9e0   :  { %v1544_v26 = vsel %vm142_vm2, %v4846_v25, 0.0 }
 0x9e1   :  { %1545 = vadd.xlane.f32.xlu0 %v1544_v26 }
 0x9f7   :  { %1627 = vrot.lane.b32.xlu0 %v5032_v17, %s4937_s12 }
 0xa6e   :  { %v1546_v16 = vpop.xlane.xlu0 %1545 }
 0xa6f   :  { %4847 = vrcp.f32 %v1546_v16 }
 0xa72   :  { %v1628_v28 = vpop.permute.xlu0 %1627 }
 0xa73   :  { %4529 = vmatpush3.msra.mxu0 %v1628_v28  ;;  %v50_v28 = vld [vmem:[%s5566_s4 + $0x30] sm:$0xff] }
 0xa74   :  { %4533 = vmatprep.subr.mxu0 %v39_v27 }
 0xa79   :  { %v4848_v29 = vpop.eup %4847 }
 0xa7a   :  { %v1550_v30 = vmul.f32 %v4848_v29, %v4846_v25  ;;  %v51_v29 = vld [vmem:[%s5566_s4 + $0x38] sm:$0xff] }
 0xa7c   :  { %4531 = vmatmul.mubr.msk.f32.vlgmr.msra.gmra.mrb[12].mxu0 %vm142_vm2, %v1550_v30  ;;  %v4748_v30 = vpack.c.bf16 %v51_v29, %v50_v28 }
 0xa7d   :  { %4534 = vmatpush3.msra.mxu0 %v39_v27 }
 0xa7e   :  { %4737 = vmatprep.subr.bf16.mxu0 %v4736_v61 }
 0xaa9   :  { %v1623_v31 = vpop.f32.mrb[20].mxu1 }
 0xaaa   :  { %v4527_v32 = vpop.f32.mrb[21].mxu1  ;;  %4535 = vmatprep.mubr.msk.f32.mxu0 %vm142_vm2, %v1623_v31  ;;  %v1835_v31 = vsub.s32 4, %v5013_v10 }
 0xaac   :  { %v1836_v32 = vrot.slane %v5023_v12, %v1835_v31 }
 0xb4f   :  { %v1699_v33 = vpop.f32.mrb[12].mxu0 }
 0xb50   :  { %v4532_v17 = vpop.f32.mrb[13].mxu0  ;;  %4536 = vmatmul.mubr.msk.f32.vlgmr.msra.gmra.mrb[6].mxu0 %vm142_vm2, %v1699_v33 }
 0xb51   :  { %4739 = vmatpush3.bf16.msra.mxu0 %v4736_v61  ;;  %v4232_v61 = vld [vmem:[%s5563_s1 + $0x38] sm:$0xff] }
 0xb52   :  { %4741 = vmatprep.subr.bf16.mxu0 %v4740_v63  ;;  %v4756_v62 = vpack.c.bf16 %v4232_v61, %v4231_v60 }
 0xb55   :  { %4743 = vmatpush3.bf16.msra.mxu0 %v4740_v63 }
 0xb56   :  { %4745 = vmatprep.subr.bf16.mxu0 %v4744_v2 }
 0xb59   :  { %4747 = vmatpush3.bf16.msra.mxu0 %v4744_v2 }
 0xb5a   :  { %4749 = vmatprep.subr.bf16.mxu0 %v4748_v30 }
 0xb5d   :  { %4751 = vmatpush3.bf16.msra.mxu0 %v4748_v30 }
 0xb5e   :  { %4589 = vmatprep.subr.mxu0 %v4925_v8 }
 0xc23   :  { %v4537_v36 = vpop.f32.mrb[6].mxu0 }
 0xc24   :  { %v1791_v37 = vadd.f32 %v4537_v36, %v1789_v35  ;;  %v1775_v38 = vpop.f32.mrb[7].mxu0 }
 0xc25   :  { %v1790_v39 = vadd.f32 %v1789_v35, %v1775_v38 }
 0xc26   :  { %v1793_v40 = vadd.f32 %v1791_v37, %v5007_v7 }
 0xc27   :  { %v1792_v41 = vadd.f32 %v1790_v39, %v5000_v5  ;;  %v40_v5 = vld [vmem:[%s5565_s3] sm:$0xff]  ;;  %v1922_v39 = vsub.s32 5, %v5013_v10 }
 0xc28   :  { %v1797_v42 = vsel %vm57_vm0, %v1793_v40, 0.0  ;;  %v4728_v54 = vpack.c.bf16 %v41_v53, %v40_v5 }
 0xc29   :  { %1798 = vadd.xlane.f32.xlu0 %v1797_v42  ;;  %v1794_v43 = vsel %vm57_vm0, %v1792_v41, 0.0 }
 0xc2a   :  { %1795 = vadd.xlane.f32.xlu1 %v1794_v43  ;;  %4729 = vmatprep.subr.bf16.mxu1 %v4728_v54 }
 0xc2b   :  { %4731 = vmatpush3.bf16.msra.mxu1 %v4728_v54 }
 0xc2c   :  { %4733 = vmatprep.subr.bf16.mxu1 %v4732_v57 }
 0xc2f   :  { %4735 = vmatpush3.bf16.msra.mxu1 %v4732_v57  ;;  %v4229_v57 = vld [vmem:[%s5563_s1 + $0x20] sm:$0xff] }
 0xc30   :  { %v4752_v59 = vpack.c.bf16 %v4230_v58, %v4229_v57 }
 0xc32   :  { %4753 = vmatprep.subr.bf16.mxu1 %v4752_v59 }
 0xcb6   :  { %v1799_v44 = vpop.xlane.xlu0 %1798 }
 0xcb7   :  { %v1802_v45 = vmul.f32 0.03125, %v1799_v44  ;;  %v1796_v46 = vpop.xlane.xlu1 %1795 }
 0xcb8   :  { %v1801_v47 = vmul.f32 0.03125, %v1796_v46 }
 0xcb9   :  { %v1804_v48 = vsub.f32 %v1793_v40, %v1802_v45  ;;  %v1923_v40 = vrot.slane %v5023_v12, %v1922_v39 }
 0xcba   :  { %v1803_v49 = vsub.f32 %v1792_v41, %v1801_v47 }
 0xcbb   :  { %v1806_v50 = vmul.f32 %v1804_v48, %v1804_v48 }
 0xcbc   :  { %v1805_v51 = vmul.f32 %v1803_v49, %v1803_v49 }
 0xcbd   :  { %v1810_v52 = vsel %vm57_vm0, %v1806_v50, 0.0 }
 0xcbe   :  { %1811 = vadd.xlane.f32.xlu0 %v1810_v52  ;;  %v1807_v7 = vsel %vm57_vm0, %v1805_v51, 0.0 }
 0xcbf   :  { %1808 = vadd.xlane.f32.xlu1 %v1807_v7 }
 0xd4b   :  { %v1812_v3 = vpop.xlane.xlu0 %1811 }
 0xd4c   :  { %v1814_v4 = vmul.f32 0.03125, %v1812_v3  ;;  %v1809_v6 = vpop.xlane.xlu1 %1808 }
 0xd4d   :  { %v1813_v9 = vmul.f32 0.03125, %v1809_v6  ;;  %v2036_v6 = vsub.s32 6, %v5013_v10 }
 0xd4e   :  { %v1816_v13 = vadd.f32 1e-05, %v1814_v4 }
 0xd4f   :  { %v1815_v14 = vadd.f32 1e-05, %v1813_v9  ;;  %v2042_v9 = vsub.s32 7, %v5013_v10 }
 0xd50   :  { %4849 = vrsqrt.f32 %v1816_v13  ;;  %v2037_v13 = vrot.slane %v5023_v12, %v2036_v6 }
 0xd51   :  { %4851 = vrsqrt.f32 %v1815_v14 }
 0xd5a   :  { %v4850_v20 = vpop.eup %4849 }
 0xd5b   :  { %v4852_v21 = vpop.eup %4851  ;;  %v1820_v22 = vmul.f32 %v4850_v20, %v1804_v48 }
 0xd5c   :  { %v1819_v23 = vmul.f32 %v4852_v21, %v1803_v49 }
 0xd5d   :  { %v1826_v25 = vmul.f32 %v1824_v19, %v1820_v22  ;;  %v2043_v22 = vrot.slane %v5023_v12, %v2042_v9 }
 0xd5e   :  { %v1825_v26 = vmul.f32 %v1824_v19, %v1819_v23 }
 0xd5f   :  { %v1832_v27 = vadd.f32 %v1830_v24, %v1826_v25 }
 0xd60   :  { %v1831_v16 = vadd.f32 %v1830_v24, %v1825_v26 }
 0xd62   :  { %4546 = vmatprep.mubr.msk.f32.mxu1 %vm57_vm0, %v1831_v16 }
 0xd63   :  { %4547 = vmatmul.mubr.msk.f32.vlgmr.msra.gmra.mrb[22].mxu1 %vm57_vm0, %v1832_v27 }
 0xd64   :  { %4755 = vmatpush3.bf16.msra.mxu1 %v4752_v59 }
 0xd65   :  { %4757 = vmatprep.subr.bf16.mxu1 %v4756_v62 }
 0xd68   :  { %4759 = vmatpush3.bf16.msra.mxu1 %v4756_v62 }
 0xd69   :  { %4579 = vmatprep.subr.mxu1 %v4925_v8 }
 0xe36   :  { %v4548_v33 = vpop.f32.mrb[22].mxu1 }
 0xe37   :  { %v1915_v17 = vadd.f32 %v4548_v33, %v1836_v32  ;;  %v1909_v35 = vpop.f32.mrb[23].mxu1 }
 0xe38   :  { %v1910_v36 = vadd.f32 %v1909_v35, %v1836_v32 }
 0xe39   :  { %v1919_v38 = vmax.f32 %v1915_v17, 0.0 }
 0xe3a   :  { %v1918_v37 = vmax.f32 %v1910_v36, 0.0 }
 0xe3c   :  { %4565 = vmatprep.mubr.msk.f32.mxu0 %vm1924_vm3, %v1918_v37 }
 0xe3d   :  { %4566 = vmatmul.mubr.msk.f32.vlgmr.msra.gmra.mrb[14].mxu0 %vm1924_vm3, %v1919_v38 }
 0xe3e   :  { %4591 = vmatprep.mubr.msk.f32.mxu0 %vm4926_vm1, %v4925_v8 }
 0xf10   :  { %v4567_v41 = vpop.f32.mrb[14].mxu0 }
 0xf11   :  { %v2003_v42 = vadd.f32 %v4567_v41, %v1923_v40  ;;  %v1997_v43 = vpop.f32.mrb[15].mxu0 }
 0xf12   :  { %v1998_v44 = vadd.f32 %v1997_v43, %v1923_v40 }
 0xf13   :  { %v2007_v45 = vadd.f32 %v2003_v42, %v1832_v27 }
 0xf14   :  { %v2006_v46 = vadd.f32 %v1998_v44, %v1831_v16  ;;  %v5293_v16 = vld [vmem:[%s5567_s5 + $0x8] sm:$0xff] }
 0xf15   :  { %v2011_v47 = vsel %vm57_vm0, %v2007_v45, 0.0  ;;  %v2075_v12 = vrot.slane %v5293_v16, %v55_v11 }
 0xf16   :  { %2012 = vadd.xlane.f32.xlu0 %v2011_v47  ;;  %v2008_v48 = vsel %vm57_vm0, %v2006_v46, 0.0 }
 0xf17   :  { %2009 = vadd.xlane.f32.xlu1 %v2008_v48 }
 0xfa3   :  { %v2013_v49 = vpop.xlane.xlu0 %2012 }
 0xfa4   :  { %v2015_v50 = vmul.f32 0.03125, %v2013_v49  ;;  %v2010_v51 = vpop.xlane.xlu1 %2009 }
 0xfa5   :  { %v2014_v52 = vmul.f32 0.03125, %v2010_v51 }
 0xfa6   :  { %v2017_v7 = vsub.f32 %v2007_v45, %v2015_v50 }
 0xfa7   :  { %v2016_v5 = vsub.f32 %v2006_v46, %v2014_v52 }
 0xfa8   :  { %v2019_v53 = vmul.f32 %v2017_v7, %v2017_v7 }
 0xfa9   :  { %v2018_v54 = vmul.f32 %v2016_v5, %v2016_v5 }
 0xfaa   :  { %v2023_v55 = vsel %vm57_vm0, %v2019_v53, 0.0 }
 0xfab   :  { %2024 = vadd.xlane.f32.xlu0 %v2023_v55  ;;  %v2020_v56 = vsel %vm57_vm0, %v2018_v54, 0.0 }
 0xfac   :  { %2021 = vadd.xlane.f32.xlu1 %v2020_v56 }
0x1038   :  { %v2025_v63 = vpop.xlane.xlu0 %2024 }
0x1039   :  { %v2027_v0 = vmul.f32 0.03125, %v2025_v63  ;;  %v2022_v1 = vpop.xlane.xlu1 %2021 }
0x103a   :  { %v2026_v2 = vmul.f32 0.03125, %v2022_v1 }
0x103b   :  { %v2029_v3 = vadd.f32 1e-05, %v2027_v0 }
0x103c   :  { %v2028_v4 = vadd.f32 1e-05, %v2026_v2 }
0x103d   :  { %4853 = vrsqrt.f32 %v2029_v3 }
0x103e   :  { %4855 = vrsqrt.f32 %v2028_v4 }
0x1047   :  { %v4854_v14 = vpop.eup %4853 }
0x1048   :  { %v4856_v19 = vpop.eup %4855  ;;  %v2033_v20 = vmul.f32 %v4854_v14, %v2017_v7 }
0x1049   :  { %v2032_v21 = vmul.f32 %v4856_v19, %v2016_v5 }
0x104a   :  { %v2039_v23 = vmul.f32 %v2037_v13, %v2033_v20 }
0x104b   :  { %v2038_v24 = vmul.f32 %v2037_v13, %v2032_v21 }
0x104c   :  { %v5282_v26 = vadd.f32 %v2043_v22, %v2039_v23 }
0x104d   :  { %v5280_v25 = vadd.f32 %v2043_v22, %v2038_v24 }
0x104f   :  { %4576 = vmatprep.mubr.msk.f32.mxu1 %vm57_vm0, %v5280_v25 }
0x1050   :  { %4577 = vmatmul.mubr.msk.f32.vlgmr.msra.gmra.mrb[24].mxu1 %vm57_vm0, %v5282_v26 }
0x1051   :  { %4581 = vmatprep.mubr.msk.f32.mxu1 %vm4926_vm1, %v4925_v8 }
0x1123   :  { %v4578_v27 = vpop.f32.mrb[24].mxu1 }
0x1124   :  { %v5298_v28 = vadd.f32 %v4578_v27, %v2075_v12  ;;  %v2148_v29 = vpop.f32.mrb[25].mxu1 }
0x1125   :  { %v5300_v30 = vadd.f32 %v2148_v29, %v2075_v12 }
0x1126   :  { %2235 = vrot.lane.b32.xlu0 %v5298_v28, %s4927_s18 }
0x1127   :  { %2158 = vrot.lane.b32.xlu1 %v5300_v30, %s4927_s18 }
0x1198   :  { %v2236_v33 = vpop.permute.xlu0 %2235 }
0x1199   :  { %v2159_v32 = vpop.permute.xlu1 %2158 }
0x119a   :  { %4580 = vmatpush3.xpose.msk.msra.mxu1 %vm142_vm2, %v2159_v32 }
0x119b   :  { %4584 = vmatprep.subr.mxu1 %v4925_v8 }
0x119d   :  { %4582 = vmatmul.mubr.msk.f32.vlgmr.msra.gmra.mrb[26].mxu1 %vm142_vm2, %v5300_v30 }
0x119e   :  { %4585 = vmatpush3.xpose.msk.msra.mxu1 %vm142_vm2, %v2236_v33  ;;  %4586 = vmatprep.mubr.msk.f32.mxu1 %vm4926_vm1, %v4925_v8 }
0x119f   :  { %4594 = vmatprep.subr.mxu1 %v4925_v8 }
0x11a1   :  { %4587 = vmatmul.mubr.msk.f32.vlgmr.msra.gmra.mrb[28].mxu1 %vm142_vm2, %v5298_v28 }
0x11a2   :  { %4596 = vmatprep.mubr.msk.f32.mxu1 %vm4926_vm1, %v4925_v8 }
0x1270   :  { %v2230_v11 = vpop.f32.mrb[26].mxu1 }
0x1271   :  { %v4583_v17 = vpop.f32.mrb[27].mxu1  ;;  %v2311_v38 = vsel %vm142_vm2, %v2230_v11, -inf }
0x1274   :  { %v2307_v35 = vpop.f32.mrb[28].mxu1 }
0x1275   :  { %v4588_v36 = vpop.f32.mrb[29].mxu1  ;;  %v2314_v37 = vsel %vm142_vm2, %v2307_v35, -inf }
0x1276   :  { %2315 = vmax.xlane.f32.xlu1 %v2314_v37 }
0x1287   :  { %2409 = vrot.lane.b32.xlu1 %v5298_v28, %s4928_s19 }
0x128b   :  { %2563 = vrot.lane.b32.xlu1 %v5298_v28, %s4930_s21 }
0x12af   :  { %2312 = vmax.xlane.f32.xlu1 %v2311_v38 }
0x12c0   :  { %2487 = vrot.lane.b32.xlu1 %v5300_v30, %s4929_s20 }
0x12c4   :  { %2485 = vrot.lane.b32.xlu1 %v5300_v30, %s4930_s21 }
0x12c8   :  { %2979 = vrot.lane.b32.xlu1 %v5300_v30, %s4933_s24 }
0x1303   :  { %v2316_v40 = vpop.xlane.xlu1 %2315 }
0x1304   :  { %v2318_v41 = vsub.f32 %v2307_v35, %v2316_v40 }
0x1306   :  { %v2321_v42 = vmul.f32 1.442695, %v2318_v41 }
0x1307   :  { %v2410_v43 = vpop.permute.xlu1 %2409 }
0x1308   :  { %4857 = vpow2.f32 %v2321_v42  ;;  %4595 = vmatpush3.msra.mxu1 %v2410_v43 }
0x1309   :  { %4604 = vmatprep.subr.mxu1 %v4925_v8 }
0x130b   :  { %v2564_v46 = vpop.permute.xlu1 %2563 }
0x1312   :  { %v4858_v44 = vpop.eup %4857 }
0x1313   :  { %v2326_v45 = vsel %vm142_vm2, %v4858_v44, 0.0 }
0x1314   :  { %2327 = vadd.xlane.f32.xlu0 %v2326_v45 }
0x132a   :  { %2565 = vrot.lane.b32.xlu0 %v5298_v28, %s4929_s20 }
0x133c   :  { %v2313_v47 = vpop.xlane.xlu1 %2312 }
0x133d   :  { %v2317_v48 = vsub.f32 %v2230_v11, %v2313_v47 }
0x133f   :  { %v2319_v49 = vmul.f32 1.442695, %v2317_v48 }
0x1340   :  { %v2488_v57 = vpop.permute.xlu1 %2487 }
0x1341   :  { %4859 = vpow2.f32 %v2319_v49 }
0x1344   :  { %v2486_v59 = vpop.permute.xlu1 %2485 }
0x1348   :  { %v2980_v24 = vpop.permute.xlu1 %2979 }
0x134b   :  { %v4860_v50 = vpop.eup %4859 }
0x134c   :  { %v2323_v51 = vsel %vm142_vm2, %v4860_v50, 0.0 }
0x134d   :  { %2324 = vadd.xlane.f32.xlu0 %v2323_v51 }
0x1363   :  { %2333 = vrot.lane.b32.xlu0 %v5300_v30, %s4928_s19 }
0x13a1   :  { %v2328_v52 = vpop.xlane.xlu0 %2327 }
0x13a2   :  { %4861 = vrcp.f32 %v2328_v52 }
0x13a5   :  { %v2566_v53 = vpop.permute.xlu0 %2565 }
0x13ac   :  { %v4862_v7 = vpop.eup %4861 }
0x13ad   :  { %v2332_v5 = vmul.f32 %v4862_v7, %v4858_v44  ;;  %v4234_v7 = vld [vmem:[%s5564_s2 + $0x28] sm:$0xff] }
0x13af   :  { %4597 = vmatmul.mubr.msk.f32.vlgmr.msra.gmra.mrb[30].mxu1 %vm142_vm2, %v2332_v5  ;;  %v4233_v5 = vld [vmem:[%s5564_s2 + $0x20] sm:$0xff] }
0x13b0   :  { %4605 = vmatpush3.xpose.msk.msra.mxu1 %vm142_vm2, %v2566_v53  ;;  %4606 = vmatprep.mubr.msk.f32.mxu1 %vm4926_vm1, %v4925_v8 }
0x13b1   :  { %4614 = vmatprep.subr.mxu1 %v4925_v8 }
0x13b3   :  { %4607 = vmatmul.mubr.msk.f32.vlgmr.msra.gmra.mrb[32].mxu1 %vm142_vm2, %v2564_v46 }
0x13b4   :  { %4616 = vmatprep.mubr.msk.f32.mxu1 %vm4926_vm1, %v4925_v8 }
0x13da   :  { %v2325_v54 = vpop.xlane.xlu0 %2324 }
0x13db   :  { %4863 = vrcp.f32 %v2325_v54 }
0x13de   :  { %v2334_v55 = vpop.permute.xlu0 %2333 }
0x13df   :  { %4590 = vmatpush3.msra.mxu0 %v2334_v55 }
0x13e0   :  { %4599 = vmatprep.subr.mxu0 %v4925_v8 }
0x13e5   :  { %v4864_v56 = vpop.eup %4863 }
0x13e6   :  { %v2331_v58 = vmul.f32 %v4864_v56, %v4860_v50 }
0x13e8   :  { %4592 = vmatmul.mubr.msk.f32.vlgmr.msra.gmra.mrb[16].mxu0 %vm142_vm2, %v2331_v58 }
0x13e9   :  { %4600 = vmatpush3.xpose.msk.msra.mxu0 %vm142_vm2, %v2488_v57  ;;  %4601 = vmatprep.mubr.msk.f32.mxu0 %vm4926_vm1, %v4925_v8 }
0x13ea   :  { %4609 = vmatprep.subr.mxu0 %v4925_v8 }
0x13ec   :  { %4602 = vmatmul.mubr.msk.f32.vlgmr.msra.gmra.mrb[18].mxu0 %vm142_vm2, %v2486_v59 }
0x13ed   :  { %4611 = vmatprep.mubr.msk.f32.mxu0 %vm4926_vm1, %v4925_v8 }
0x1482   :  { %v5354_v60 = vpop.f32.mrb[30].mxu1 }
0x1483   :  { %v4598_v61 = vpop.f32.mrb[31].mxu1 }
0x1486   :  { %v2637_v62 = vpop.f32.mrb[32].mxu1 }
0x1487   :  { %v4608_v63 = vpop.f32.mrb[33].mxu1  ;;  %v2644_v0 = vsel %vm142_vm2, %v2637_v62, -inf }
0x1488   :  { %2645 = vmax.xlane.f32.xlu0 %v2644_v0 }
0x149e   :  { %2739 = vrot.lane.b32.xlu0 %v5298_v28, %s4931_s22 }
0x14a2   :  { %2977 = vrot.lane.b32.xlu0 %v5300_v30, %s4932_s23 }
0x14a6   :  { %3055 = vrot.lane.b32.xlu0 %v5298_v28, %s4932_s23 }
0x14bb   :  { %v5363_v1 = vpop.f32.mrb[16].mxu0 }
0x14bc   :  { %v4593_v2 = vpop.f32.mrb[17].mxu0 }
0x14bf   :  { %v2559_v3 = vpop.f32.mrb[18].mxu0 }
0x14c0   :  { %v4603_v4 = vpop.f32.mrb[19].mxu0  ;;  %v2641_v23 = vsel %vm142_vm2, %v2559_v3, -inf }
0x1515   :  { %v2646_v13 = vpop.xlane.xlu0 %2645 }
0x1516   :  { %v2648_v14 = vsub.f32 %v2637_v62, %v2646_v13  ;;  %v4235_v13 = vld [vmem:[%s5564_s2 + $0x30] sm:$0xff] }
0x1518   :  { %v2651_v19 = vmul.f32 1.442695, %v2648_v14 }
0x1519   :  { %v2740_v20 = vpop.permute.xlu0 %2739 }
0x151a   :  { %4865 = vpow2.f32 %v2651_v19  ;;  %4615 = vmatpush3.msra.mxu1 %v2740_v20 }
0x151b   :  { %4629 = vmatprep.subr.mxu1 %v4925_v8 }
0x151d   :  { %v2978_v32 = vpop.permute.xlu0 %2977 }
0x1521   :  { %v3056_v11 = vpop.permute.xlu0 %3055 }
0x1524   :  { %v4866_v21 = vpop.eup %4865 }
0x1525   :  { %v2656_v22 = vsel %vm142_vm2, %v4866_v21, 0.0 }
0x1526   :  { %2657 = vadd.xlane.f32.xlu1 %v2656_v22 }
0x1537   :  { %3057 = vrot.lane.b32.xlu1 %v5298_v28, %s4933_s24 }
0x155b   :  { %2642 = vmax.xlane.f32.xlu1 %v2641_v23 }
0x15b3   :  { %v2658_v12 = vpop.xlane.xlu1 %2657 }
0x15b4   :  { %4867 = vrcp.f32 %v2658_v12 }
0x15b7   :  { %v3058_v33 = vpop.permute.xlu1 %3057 }
0x15be   :  { %v4868_v27 = vpop.eup %4867 }
0x15bf   :  { %v2662_v29 = vmul.f32 %v4868_v27, %v4866_v21 }
0x15c1   :  { %4617 = vmatmul.mubr.msk.f32.vlgmr.msra.gmra.mrb[34].mxu1 %vm142_vm2, %v2662_v29 }
0x15c2   :  { %4630 = vmatpush3.xpose.msk.msra.mxu1 %vm142_vm2, %v2980_v24  ;;  %4631 = vmatprep.mubr.msk.f32.mxu1 %vm4926_vm1, %v4925_v8 }
0x15c3   :  { %4634 = vmatprep.subr.mxu1 %v4925_v8 }
0x15c5   :  { %4632 = vmatmul.mubr.msk.f32.vlgmr.msra.gmra.mrb[36].mxu1 %vm142_vm2, %v2978_v32 }
0x15c6   :  { %4635 = vmatpush3.xpose.msk.msra.mxu1 %vm142_vm2, %v3058_v33  ;;  %4636 = vmatprep.mubr.msk.f32.mxu1 %vm4926_vm1, %v4925_v8 }
0x15c7   :  { %4644 = vmatprep.subr.mxu1 %v4925_v8 }
0x15c9   :  { %4637 = vmatmul.mubr.msk.f32.vlgmr.msra.gmra.mrb[38].mxu1 %vm142_vm2, %v3056_v11 }
0x15ca   :  { %4646 = vmatprep.mubr.msk.f32.mxu1 %vm4926_vm1, %v4925_v8 }
0x15e8   :  { %v2643_v17 = vpop.xlane.xlu1 %2642 }
0x15e9   :  { %v2647_v35 = vsub.f32 %v2559_v3, %v2643_v17 }
0x15eb   :  { %v2649_v36 = vmul.f32 1.442695, %v2647_v35 }
0x15ed   :  { %4869 = vpow2.f32 %v2649_v36 }
0x15f7   :  { %v4870_v37 = vpop.eup %4869 }
0x15f8   :  { %v2653_v38 = vsel %vm142_vm2, %v4870_v37, 0.0 }
0x15f9   :  { %2654 = vadd.xlane.f32.xlu0 %v2653_v38 }
0x160f   :  { %2663 = vrot.lane.b32.xlu0 %v5300_v30, %s4931_s22 }
0x1613   :  { %3231 = vrot.lane.b32.xlu0 %v5298_v28, %s4934_s25 }
0x1617   :  { %3392 = vrot.lane.b32.xlu0 %v5300_v30, %s4935_s26 }
0x161b   :  { %3470 = vrot.lane.b32.xlu0 %v5298_v28, %s4935_s26 }
0x161f   :  { %3390 = vrot.lane.b32.xlu0 %v5300_v30, %s4936_s27 }
0x1686   :  { %v2655_v40 = vpop.xlane.xlu0 %2654 }
0x1687   :  { %4871 = vrcp.f32 %v2655_v40 }
0x168a   :  { %v2664_v41 = vpop.permute.xlu0 %2663 }
0x168b   :  { %4610 = vmatpush3.msra.mxu0 %v2664_v41 }
0x168c   :  { %4619 = vmatprep.subr.mxu0 %v4234_v7 }
0x168e   :  { %v3232_v42 = vpop.permute.xlu0 %3231 }
0x168f   :  { %4645 = vmatpush3.msra.mxu1 %v3232_v42 }
0x1690   :  { %4654 = vmatprep.subr.mxu1 %v4925_v8 }
0x1691   :  { %v4872_v43 = vpop.eup %4871 }
0x1692   :  { %v2661_v44 = vmul.f32 %v4872_v43, %v4870_v37  ;;  %v3393_v19 = vpop.permute.xlu0 %3392 }
0x1694   :  { %4612 = vmatmul.mubr.msk.f32.vlgmr.msra.gmra.mrb[20].mxu0 %vm142_vm2, %v2661_v44  ;;  %v2811_v45 = vpop.f32.mrb[34].mxu1 }
0x1695   :  { %v4618_v46 = vpop.f32.mrb[35].mxu1  ;;  %4620 = vmatpush3.msra.mxu0 %v4234_v7  ;;  %v4236_v7 = vld [vmem:[%s5564_s2 + $0x38] sm:$0xff] }
0x1696   :  { %4624 = vmatprep.subr.mxu0 %v4233_v5  ;;  %v3471_v21 = vpop.permute.xlu0 %3470 }
0x1698   :  { %v3051_v47 = vpop.f32.mrb[36].mxu1 }
0x1699   :  { %v4633_v48 = vpop.f32.mrb[37].mxu1  ;;  %v3133_v49 = vsel %vm142_vm2, %v3051_v47, -inf }
0x169a   :  { %3134 = vmax.xlane.f32.xlu1 %v3133_v49  ;;  %v3391_v23 = vpop.permute.xlu0 %3390 }
0x169c   :  { %v3129_v50 = vpop.f32.mrb[38].mxu1 }
0x169d   :  { %v4638_v51 = vpop.f32.mrb[39].mxu1  ;;  %v3136_v52 = vsel %vm142_vm2, %v3129_v50, -inf }
0x169e   :  { %3137 = vmax.xlane.f32.xlu1 %v3136_v52 }
0x1727   :  { %v3135_v53 = vpop.xlane.xlu1 %3134 }
0x1728   :  { %v3139_v54 = vsub.f32 %v3051_v47, %v3135_v53 }
0x172a   :  { %v3141_v55 = vmul.f32 1.442695, %v3139_v54 }
0x172b   :  { %v3138_v56 = vpop.xlane.xlu1 %3137 }
0x172c   :  { %4873 = vpow2.f32 %v3141_v55  ;;  %v3140_v57 = vsub.f32 %v3129_v50, %v3138_v56 }
0x172e   :  { %v3143_v58 = vmul.f32 1.442695, %v3140_v57 }
0x1730   :  { %4875 = vpow2.f32 %v3143_v58  ;;  %v3806_v58 = vrot.slane %v5293_v16, %v1788_v34 }
0x1736   :  { %v4874_v59 = vpop.eup %4873 }
0x1737   :  { %v3145_v61 = vsel %vm142_vm2, %v4874_v59, 0.0 }
0x1738   :  { %3146 = vadd.xlane.f32.xlu1 %v3145_v61 }
0x173a   :  { %v4876_v62 = vpop.eup %4875 }
0x173b   :  { %v3148_v63 = vsel %vm142_vm2, %v4876_v62, 0.0 }
0x173c   :  { %3149 = vadd.xlane.f32.xlu1 %v3148_v63 }
0x174d   :  { %3155 = vrot.lane.b32.xlu1 %v5300_v30, %s4934_s25 }
0x1751   :  { %3468 = vrot.lane.b32.xlu1 %v5298_v28, %s4936_s27 }
0x1767   :  { %v2735_v0 = vpop.f32.mrb[20].mxu0 }
0x1768   :  { %v4613_v2 = vpop.f32.mrb[21].mxu0  ;;  %4621 = vmatprep.mubr.msk.f32.mxu0 %vm142_vm2, %v2735_v0 }
0x1769   :  { %4622 = vmatmul.mubr.msk.f32.vlgmr.msra.gmra.mrb[22].mxu0 %vm142_vm2, %v2811_v45 }
0x176a   :  { %4626 = vmatprep.mubr.msk.f32.mxu0 %vm142_vm2, %v5363_v1  ;;  %4625 = vmatpush3.msra.mxu0 %v4233_v5 }
0x176b   :  { %4639 = vmatprep.subr.mxu0 %v4925_v8 }
0x1771   :  { %4627 = vmatmul.mubr.msk.f32.vlgmr.msra.gmra.mrb[22].mxu0 %vm142_vm2, %v5354_v60 }
0x1772   :  { %4641 = vmatprep.mubr.msk.f32.mxu0 %vm4926_vm1, %v4925_v8 }
0x17c5   :  { %v3147_v3 = vpop.xlane.xlu1 %3146 }
0x17c6   :  { %4877 = vrcp.f32 %v3147_v3 }
0x17c9   :  { %v3150_v4 = vpop.xlane.xlu1 %3149 }
0x17ca   :  { %4879 = vrcp.f32 %v3150_v4 }
0x17cd   :  { %v3156_v14 = vpop.permute.xlu1 %3155 }
0x17ce   :  { %4640 = vmatpush3.msra.mxu0 %v3156_v14 }
0x17cf   :  { %4649 = vmatprep.subr.mxu0 %v4235_v13 }
0x17d0   :  { %v4878_v1 = vpop.eup %4877 }
0x17d1   :  { %v3153_v20 = vmul.f32 %v4878_v1, %v4874_v59  ;;  %v3469_v32 = vpop.permute.xlu1 %3468 }
0x17d3   :  { %4642 = vmatmul.mubr.msk.f32.vlgmr.msra.gmra.mrb[24].mxu0 %vm142_vm2, %v3153_v20 }
0x17d4   :  { %v4880_v60 = vpop.eup %4879  ;;  %4650 = vmatpush3.msra.mxu0 %v4235_v13 }
0x17d5   :  { %v3154_v22 = vmul.f32 %v4880_v60, %v4876_v62  ;;  %4659 = vmatprep.subr.mxu0 %v4925_v8 }
0x17d7   :  { %4647 = vmatmul.mubr.msk.f32.vlgmr.msra.gmra.mrb[40].mxu1 %vm142_vm2, %v3154_v22 }
0x17d8   :  { %4655 = vmatpush3.xpose.msk.msra.mxu1 %vm142_vm2, %v3393_v19  ;;  %4656 = vmatprep.mubr.msk.f32.mxu1 %vm4926_vm1, %v4925_v8 }
0x17d9   :  { %4664 = vmatprep.subr.mxu1 %v4925_v8 }
0x17db   :  { %4657 = vmatmul.mubr.msk.f32.vlgmr.msra.gmra.mrb[42].mxu1 %vm142_vm2, %v3391_v23  ;;  %v4238_v23 = vld [vmem:[%s5565_s3 + $0x28] sm:$0xff] }
0x17dc   :  { %4666 = vmatprep.mubr.msk.f32.mxu1 %vm4926_vm1, %v4925_v8 }
0x18a6   :  { %v3227_v24 = vpop.f32.mrb[24].mxu0 }
0x18a7   :  { %v4643_v12 = vpop.f32.mrb[25].mxu0  ;;  %4651 = vmatprep.mubr.msk.f32.mxu0 %vm142_vm2, %v3227_v24 }
0x18a8   :  { %v4239_v12 = vld [vmem:[%s5565_s3 + $0x30] sm:$0xff] }
0x18aa   :  { %v3303_v27 = vpop.f32.mrb[40].mxu1 }
0x18ab   :  { %v4648_v29 = vpop.f32.mrb[41].mxu1  ;;  %4652 = vmatmul.mubr.msk.f32.vlgmr.msra.gmra.mrb[22].mxu0 %vm142_vm2, %v3303_v27  ;;  %v4240_v27 = vld [vmem:[%s5565_s3 + $0x38] sm:$0xff] }
0x18ac   :  { %4660 = vmatpush3.xpose.msk.msra.mxu0 %vm142_vm2, %v3471_v21  ;;  %4661 = vmatprep.mubr.msk.f32.mxu0 %vm4926_vm1, %v4925_v8  ;;  %v4764_v29 = vpack.c.bf16 %v4240_v27, %v4239_v12  ;;  %v4938_v12 = vmov 0.0|0.0  }
0x18ad   :  { %4669 = vmatprep.subr.mxu0 %v4925_v8 }
0x18ae   :  { %v3464_v33 = vpop.f32.mrb[42].mxu1 }
0x18af   :  { %v4658_v11 = vpop.f32.mrb[43].mxu1  ;;  %4662 = vmatmul.mubr.msk.f32.vlgmr.msra.gmra.mrb[26].mxu0 %vm142_vm2, %v3469_v32  ;;  %v3546_v17 = vsel %vm142_vm2, %v3464_v33, -inf  ;;  %v4241_v32 = vld [vmem:[%s5566_s4 + $0x40] sm:$0xff] }
0x18b0   :  { %3547 = vmax.xlane.f32.xlu0 %v3546_v17  ;;  %4671 = vmatprep.mubr.msk.f32.mxu0 %vm4926_vm1, %v4925_v8  ;;  %v4243_v11 = vld [vmem:[%s5566_s4 + $0x50] sm:$0xff] }
0x193d   :  { %v3548_v35 = vpop.xlane.xlu0 %3547 }
0x193e   :  { %v3552_v36 = vsub.f32 %v3464_v33, %v3548_v35  ;;  %v4242_v33 = vld [vmem:[%s5566_s4 + $0x48] sm:$0xff]  ;;  %v4244_v35 = vld [vmem:[%s5566_s4 + $0x58] sm:$0xff] }
0x193f   :  { %v4768_v17 = vpack.c.bf16 %v4242_v33, %v4241_v32 }
0x1940   :  { %v3554_v37 = vmul.f32 1.442695, %v3552_v36  ;;  %v4772_v36 = vpack.c.bf16 %v4244_v35, %v4243_v11 }
0x1942   :  { %4881 = vpow2.f32 %v3554_v37  ;;  %v4245_v37 = vld [vmem:[%s5566_s4 + $0x60] sm:$0xff] }
0x194c   :  { %v4882_v38 = vpop.eup %4881 }
0x194d   :  { %v3558_v40 = vsel %vm142_vm2, %v4882_v38, 0.0 }
0x194e   :  { %3559 = vadd.xlane.f32.xlu0 %v3558_v40 }
0x1982   :  { %v3542_v41 = vpop.f32.mrb[26].mxu0 }
0x1983   :  { %v4663_v42 = vpop.f32.mrb[27].mxu0  ;;  %v3549_v43 = vsel %vm142_vm2, %v3542_v41, -inf }
0x1984   :  { %3550 = vmax.xlane.f32.xlu1 %v3549_v43 }
0x1995   :  { %3568 = vrot.lane.b32.xlu1 %v5300_v30, %s4937_s12 }
0x19db   :  { %v3560_v44 = vpop.xlane.xlu0 %3559 }
0x19dc   :  { %4883 = vrcp.f32 %v3560_v44 }
0x19e6   :  { %v4884_v46 = vpop.eup %4883 }
0x19e7   :  { %v3566_v49 = vmul.f32 %v4884_v46, %v4882_v38  ;;  %v4246_v38 = vld [vmem:[%s5566_s4 + $0x68] sm:$0xff] }
0x19e8   :  { %v4776_v40 = vpack.c.bf16 %v4246_v38, %v4245_v37  ;;  %v4052_v38 = vrot.slane %v5293_v16, %v2036_v6 }
0x1a11   :  { %v3551_v45 = vpop.xlane.xlu1 %3550 }
0x1a12   :  { %v3553_v47 = vsub.f32 %v3542_v41, %v3551_v45 }
0x1a14   :  { %v3556_v48 = vmul.f32 1.442695, %v3553_v47  ;;  %v3840_v47 = vrot.slane %v5293_v16, %v1823_v15  ;;  %v4247_v15 = vld [vmem:[%s5566_s4 + $0x70] sm:$0xff] }
0x1a15   :  { %v3569_v50 = vpop.permute.xlu1 %3568 }
0x1a16   :  { %4885 = vpow2.f32 %v3556_v48  ;;  %4665 = vmatpush3.msra.mxu1 %v3569_v50 }
0x1a17   :  { %4667 = vmatmul.mubr.msk.f32.vlgmr.msra.gmra.mrb[44].mxu1 %vm142_vm2, %v3566_v49 }
0x1a20   :  { %v4886_v51 = vpop.eup %4885 }
0x1a21   :  { %v3561_v52 = vsel %vm142_vm2, %v4886_v51, 0.0 }
0x1a22   :  { %3562 = vadd.xlane.f32.xlu0 %v3561_v52  ;;  %v3846_v52 = vrot.slane %v5293_v16, %v1829_v18 }
0x1a38   :  { %3644 = vrot.lane.b32.xlu0 %v5298_v28, %s4937_s12 }
0x1aaf   :  { %v3563_v30 = vpop.xlane.xlu0 %3562 }
0x1ab0   :  { %4887 = vrcp.f32 %v3563_v30 }
0x1ab3   :  { %v3645_v5 = vpop.permute.xlu0 %3644 }
0x1ab4   :  { %4670 = vmatpush3.msra.mxu0 %v3645_v5 }
0x1ab5   :  { %4674 = vmatprep.subr.mxu0 %v4236_v7 }
0x1aba   :  { %v4888_v53 = vpop.eup %4887 }
0x1abb   :  { %v3567_v54 = vmul.f32 %v4888_v53, %v4886_v51 }
0x1abd   :  { %4672 = vmatmul.mubr.msk.f32.vlgmr.msra.gmra.mrb[28].mxu0 %vm142_vm2, %v3567_v54  ;;  %v4248_v54 = vld [vmem:[%s5566_s4 + $0x78] sm:$0xff] }
0x1abe   :  { %4675 = vmatpush3.msra.mxu0 %v4236_v7  ;;  %v4780_v18 = vpack.c.bf16 %v4248_v54, %v4247_v15 }
0x1abf   :  { %4769 = vmatprep.subr.bf16.mxu0 %v4768_v17 }
0x1aea   :  { %v3640_v55 = vpop.f32.mrb[44].mxu1 }
0x1aeb   :  { %v4668_v56 = vpop.f32.mrb[45].mxu1  ;;  %4676 = vmatprep.mubr.msk.f32.mxu0 %vm142_vm2, %v3640_v55  ;;  %v3852_v55 = vrot.slane %v5293_v16, %v1835_v31 }
0x1b90   :  { %v3716_v57 = vpop.f32.mrb[28].mxu0 }
0x1b91   :  { %v4673_v28 = vpop.f32.mrb[29].mxu0  ;;  %4677 = vmatmul.mubr.msk.f32.vlgmr.msra.gmra.mrb[22].mxu0 %vm142_vm2, %v3716_v57 }
0x1b92   :  { %4771 = vmatpush3.bf16.msra.mxu0 %v4768_v17 }
0x1b93   :  { %4773 = vmatprep.subr.bf16.mxu0 %v4772_v36 }
0x1b96   :  { %4775 = vmatpush3.bf16.msra.mxu0 %v4772_v36 }
0x1b97   :  { %4777 = vmatprep.subr.bf16.mxu0 %v4776_v40 }
0x1b9a   :  { %4779 = vmatpush3.bf16.msra.mxu0 %v4776_v40 }
0x1b9b   :  { %4781 = vmatprep.subr.bf16.mxu0 %v4780_v18 }
0x1b9e   :  { %4783 = vmatpush3.bf16.msra.mxu0 %v4780_v18 }
0x1c64   :  { %v4678_v59 = vpop.f32.mrb[22].mxu0 }
0x1c65   :  { %v3808_v61 = vadd.f32 %v4678_v59, %v3806_v58  ;;  %v3792_v62 = vpop.f32.mrb[23].mxu0 }
0x1c66   :  { %v3807_v63 = vadd.f32 %v3806_v58, %v3792_v62 }
0x1c67   :  { %v3810_v0 = vadd.f32 %v3808_v61, %v5282_v26  ;;  %v3939_v61 = vrot.slane %v5293_v16, %v1922_v39 }
0x1c68   :  { %v3809_v2 = vadd.f32 %v3807_v63, %v5280_v25  ;;  %v4237_v25 = vld [vmem:[%s5565_s3 + $0x20] sm:$0xff] }
0x1c69   :  { %v3814_v3 = vsel %vm57_vm0, %v3810_v0, 0.0  ;;  %v4760_v24 = vpack.c.bf16 %v4238_v23, %v4237_v25  ;;  %v4077_v25 = vld [vmem:[%s5568_s6] sm:$0xff]  ;;  %v4078_v23 = vld [vmem:[%s5568_s6 + $0x8] sm:$0xff] }
0x1c6a   :  { %3815 = vadd.xlane.f32.xlu0 %v3814_v3  ;;  %v3811_v4 = vsel %vm57_vm0, %v3809_v2, 0.0  ;;  %v4785_v27 = vpack.c.bf16 %v4078_v23, %v4077_v25 }
0x1c6b   :  { %3812 = vadd.xlane.f32.xlu1 %v3811_v4  ;;  %4761 = vmatprep.subr.bf16.mxu1 %v4760_v24 }
0x1c6c   :  { %4763 = vmatpush3.bf16.msra.mxu1 %v4760_v24  ;;  %v4079_v24 = vld [vmem:[%s5568_s6 + $0x10] sm:$0xff] }
0x1c6d   :  { %4765 = vmatprep.subr.bf16.mxu1 %v4764_v29 }
0x1c70   :  { %4767 = vmatpush3.bf16.msra.mxu1 %v4764_v29  ;;  %v4080_v29 = vld [vmem:[%s5568_s6 + $0x18] sm:$0xff] }
0x1c71   :  { %4784 = vmatprep.subr.bf16.mxu1 %v4938_v12  ;;  %v4788_v32 = vpack.c.bf16 %v4080_v29, %v4079_v24 }
0x1cf7   :  { %v3816_v13 = vpop.xlane.xlu0 %3815 }
0x1cf8   :  { %v3818_v14 = vmul.f32 0.03125, %v3816_v13  ;;  %v3813_v19 = vpop.xlane.xlu1 %3812 }
0x1cf9   :  { %v3817_v1 = vmul.f32 0.03125, %v3813_v19 }
0x1cfa   :  { %v3820_v20 = vsub.f32 %v3810_v0, %v3818_v14 }
0x1cfb   :  { %v3819_v34 = vsub.f32 %v3809_v2, %v3817_v1 }
0x1cfc   :  { %v3822_v60 = vmul.f32 %v3820_v20, %v3820_v20 }
0x1cfd   :  { %v3821_v21 = vmul.f32 %v3819_v34, %v3819_v34 }
0x1cfe   :  { %v3826_v22 = vsel %vm57_vm0, %v3822_v60, 0.0 }
0x1cff   :  { %3827 = vadd.xlane.f32.xlu0 %v3826_v22  ;;  %v3823_v26 = vsel %vm57_vm0, %v3821_v21, 0.0 }
0x1d00   :  { %3824 = vadd.xlane.f32.xlu1 %v3823_v26 }
0x1d8c   :  { %v3828_v41 = vpop.xlane.xlu0 %3827 }
0x1d8d   :  { %v3830_v42 = vmul.f32 0.03125, %v3828_v41  ;;  %v3825_v43 = vpop.xlane.xlu1 %3824 }
0x1d8e   :  { %v3829_v44 = vmul.f32 0.03125, %v3825_v43 }
0x1d8f   :  { %v3832_v45 = vadd.f32 1e-05, %v3830_v42  ;;  %v4058_v42 = vrot.slane %v5293_v16, %v2042_v9 }
0x1d90   :  { %v3831_v46 = vadd.f32 1e-05, %v3829_v44 }
0x1d91   :  { %4889 = vrsqrt.f32 %v3832_v45 }
0x1d92   :  { %4891 = vrsqrt.f32 %v3831_v46 }
0x1d9b   :  { %v4890_v48 = vpop.eup %4889 }
0x1d9c   :  { %v4892_v49 = vpop.eup %4891  ;;  %v3836_v50 = vmul.f32 %v4890_v48, %v3820_v20 }
0x1d9d   :  { %v3835_v51 = vmul.f32 %v4892_v49, %v3819_v34 }
0x1d9e   :  { %v3842_v30 = vmul.f32 %v3840_v47, %v3836_v50 }
0x1d9f   :  { %v3841_v7 = vmul.f32 %v3840_v47, %v3835_v51 }
0x1da0   :  { %v3848_v53 = vadd.f32 %v3846_v52, %v3842_v30 }
0x1da1   :  { %v3847_v5 = vadd.f32 %v3846_v52, %v3841_v7 }
0x1da3   :  { %4687 = vmatprep.mubr.msk.f32.mxu1 %vm57_vm0, %v3847_v5 }
0x1da4   :  { %4688 = vmatmul.mubr.msk.f32.vlgmr.msra.gmra.mrb[46].mxu1 %vm57_vm0, %v3848_v53 }
0x1da5   :  { %4717 = vmatprep.mubr.msk.f32.mxu1 %vm4926_vm1, %v4925_v8  ;;  %4786 = vmatpush3.bf16.msra.mxu1 %v4785_v27 }
0x1da6   :  { %4787 = vmatprep.subr.bf16.mxu1 %v4938_v12 }
0x1da9   :  { %4789 = vmatpush3.bf16.msra.mxu1 %v4788_v32 }
0x1e77   :  { %v4689_v56 = vpop.f32.mrb[46].mxu1 }
0x1e78   :  { %v3931_v57 = vadd.f32 %v4689_v56, %v3852_v55  ;;  %v3925_v28 = vpop.f32.mrb[47].mxu1 }
0x1e79   :  { %v3926_v58 = vadd.f32 %v3925_v28, %v3852_v55 }
0x1e7a   :  { %v3935_v59 = vmax.f32 %v3931_v57, 0.0  ;;  %v4288_v57 = vld [vmem:[%s5569_s7] ss:$0 sm:$0xff]  ;;  %s4901_s7 = scalar_lea.vmem %s4184_s13, 32 }
0x1e7b   :  { %v3934_v8 = vmax.f32 %v3926_v58, 0.0  ;;  %p4902_p0 = scmp.ne.s32.totalorder %s4184_s13, %s4901_s7  ;;  %p4907_p2 = scmp.lt.s32.totalorder %s4901_s7, %s4901_s7 }
0x1e7d   :  { %4706 = vmatprep.mubr.msk.f32.mxu0 %vm1924_vm3, %v3934_v8  ;;  %p4908_p3 = por %p4907_p2, %p4906_p1 }
0x1e7e   :  { %4707 = vmatmul.mubr.msk.f32.vlgmr.msra.gmra.mrb[30].mxu0 %vm1924_vm3, %v3935_v59 }
0x1e7f   :  { %p4909_p4 = pnand %p4908_p3, %p4902_p0 }
0x1f51   :  { %v4708_v62 = vpop.f32.mrb[30].mxu0 }
0x1f52   :  { %v4018_v63 = vadd.f32 %v4708_v62, %v3939_v61  ;;  %v4012_v0 = vpop.f32.mrb[31].mxu0 }
0x1f53   :  { %v4013_v2 = vadd.f32 %v4012_v0, %v3939_v61 }
0x1f54   :  { %v4022_v3 = vadd.f32 %v4018_v63, %v3848_v53 }
0x1f55   :  { %v4021_v31 = vadd.f32 %v4013_v2, %v3847_v5 }
0x1f56   :  { %v4026_v4 = vsel %vm57_vm0, %v4022_v3, 0.0 }
0x1f57   :  { %4027 = vadd.xlane.f32.xlu0 %v4026_v4  ;;  %v4023_v13 = vsel %vm57_vm0, %v4021_v31, 0.0 }
0x1f58   :  { %4024 = vadd.xlane.f32.xlu1 %v4023_v13 }
0x1fe4   :  { %v4028_v14 = vpop.xlane.xlu0 %4027 }
0x1fe5   :  { %v4030_v19 = vmul.f32 0.03125, %v4028_v14  ;;  %v4025_v1 = vpop.xlane.xlu1 %4024 }
0x1fe6   :  { %v4029_v20 = vmul.f32 0.03125, %v4025_v1 }
0x1fe7   :  { %v4032_v34 = vsub.f32 %v4022_v3, %v4030_v19 }
0x1fe8   :  { %v4031_v60 = vsub.f32 %v4021_v31, %v4029_v20 }
0x1fe9   :  { %v4034_v21 = vmul.f32 %v4032_v34, %v4032_v34 }
0x1fea   :  { %v4033_v39 = vmul.f32 %v4031_v60, %v4031_v60 }
0x1feb   :  { %v4038_v22 = vsel %vm57_vm0, %v4034_v21, 0.0 }
0x1fec   :  { %4039 = vadd.xlane.f32.xlu0 %v4038_v22  ;;  %v4035_v26 = vsel %vm57_vm0, %v4033_v39, 0.0 }
0x1fed   :  { %4036 = vadd.xlane.f32.xlu1 %v4035_v26 }
0x2079   :  { %v4040_v33 = vpop.xlane.xlu0 %4039 }
0x207a   :  { %v4042_v11 = vmul.f32 0.03125, %v4040_v33  ;;  %v4037_v17 = vpop.xlane.xlu1 %4036 }
0x207b   :  { %v4041_v35 = vmul.f32 0.03125, %v4037_v17 }
0x207c   :  { %v4044_v36 = vadd.f32 1e-05, %v4042_v11 }
0x207d   :  { %v4043_v37 = vadd.f32 1e-05, %v4041_v35 }
0x207e   :  { %4893 = vrsqrt.f32 %v4044_v36 }
0x207f   :  { %4895 = vrsqrt.f32 %v4043_v37 }
0x2088   :  { %v4894_v40 = vpop.eup %4893 }
0x2089   :  { %v4896_v41 = vpop.eup %4895  ;;  %v4048_v43 = vmul.f32 %v4894_v40, %v4032_v34 }
0x208a   :  { %v4047_v44 = vmul.f32 %v4896_v41, %v4031_v60 }
0x208b   :  { %v4054_v45 = vmul.f32 %v4052_v38, %v4048_v43 }
0x208c   :  { %v4053_v46 = vmul.f32 %v4052_v38, %v4047_v44 }
0x208d   :  { %v4060_v47 = vadd.f32 %v4058_v42, %v4054_v45 }
0x208e   :  { %v4059_v48 = vadd.f32 %v4058_v42, %v4053_v46 }
0x208f   :  { %v4068_v49 = vsel %vm57_vm0, %v4060_v47, 0.0 }
0x2090   :  { %v4061_v50 = vsel %vm57_vm0, %v4059_v48, 0.0  ;;  %v4069_v51 = vrot.slane %v4068_v49, 4 }
0x2091   :  { %v4062_v52 = vrot.slane %v4061_v50, 4 }
0x2092   :  { %v4070_v30 = vadd.f32 %v4069_v51, %v4068_v49 }
0x2093   :  { %v4063_v6 = vadd.f32 %v4062_v52, %v4061_v50 }
0x2094   :  { %v4071_v7 = vrot.slane %v4070_v30, 2 }
0x2095   :  { %v4064_v5 = vrot.slane %v4063_v6, 2 }
0x2096   :  { %v4072_v53 = vadd.f32 %v4071_v7, %v4070_v30 }
0x2097   :  { %v4065_v10 = vadd.f32 %v4064_v5, %v4063_v6 }
0x2098   :  { %v4073_v15 = vrot.slane %v4072_v53, 1 }
0x2099   :  { %v4066_v9 = vrot.slane %v4065_v10, 1 }
0x209a   :  { %v4074_v16 = vadd.f32 %v4073_v15, %v4072_v53 }
0x209b   :  { %v4067_v54 = vadd.f32 %v4066_v9, %v4065_v10 }
0x209c   :  { %v4076_v18 = vmul.f32 0.125, %v4074_v16 }
0x209d   :  { %v4075_v55 = vmul.f32 0.125, %v4067_v54 }
0x209f   :  { %v4091_v56 = vsel %vm4090_vm4, %v4076_v18, %v4075_v55 }
0x20a0   :  { %4718 = vmatmul.mubr.msk.f32.vlgmr.msra.gmra.mrb[48].mxu1 %vm57_vm0, %v4091_v56 }
0x2173   :  { %v4160_v28 = vpop.f32.mrb[48].mxu1 }
0x2174   :  { %v4161_v58 = vadd.f32 %v4288_v57, %v4160_v28  ;;  %v4719_v8 = vpop.f32.mrb[49].mxu1 }
0x2176   :  { %v4165_v59 = vsel %vm4164_vm5, %v4161_v58, -inf }
0x2177   :  { %4166 = vmax.xlane.f32.xlu1 %v4165_v59 }
0x2204   :  { %v4167_v61 = vpop.xlane.xlu1 %4166 }
0x2205   :  { %v4168_v62 = vsub.f32 %v4161_v58, %v4167_v61 }
0x2207   :  { %v4169_v63 = vmul.f32 1.442695, %v4168_v62 }
0x2209   :  { %4897 = vpow2.f32 %v4169_v63 }
0x2213   :  { %v4898_v0 = vpop.eup %4897 }
0x2214   :  { %v4171_v2 = vsel %vm4164_vm5, %v4898_v0, 0.0 }
0x2215   :  { %4172 = vadd.xlane.f32.xlu0 %v4171_v2 }
0x22a2   :  { %v4173_v3 = vpop.xlane.xlu0 %4172 }
0x22a3   :  { %4899 = vrcp.f32 %v4173_v3 }
0x22ad   :  { %v4900_v31 = vpop.eup %4899 }
0x22ae   :  { %v4175_v4 = vmul.f32 %v4900_v31, %v4898_v0 }
0x22b0   :  { %4176 = vst.msk [vmem:[#allocation2] sm:$0x3] %vm4164_vm5, %v4175_v4 }
0x22b1   :  { %4912 = shalt.err (!%p4909_p4)
}
0x22b2   :  { %s4913_s16 = scalar_lea.hbm %s5570_s8, 32 }
0x22b3   :  { %p4914_p5 = scmp.ne.s32.totalorder %s5570_s8, %s4913_s16  ;;  %p4917_p6 = scmp.lt.u32.totalorder %s4913_s16, %s5570_s8 }
0x22b5   :  { %p4919_p7 = pnand %p4917_p6, %p4914_p5 }
0x22b7   :  { %4922 = shalt.err (!%p4919_p7)
}
0x22b8   :  { %4186 = dma.vmem_to_hbm [thread:$0]  %s4184_s13, 32, %s5570_s8, [#allocation3]  }
0x22b9   :  { %4923 = dma.done.wait [#allocation3], 32  }
0x22ba   :  { %4924 = vsyncadd [#allocation3], 4294967264 }
0x22bb   :  { %4190 = vsyncpa [#allocation3], 1 }

</bundles_post_ra>
